<compile_context>
chip_gen: v5e
topology: v5e:2x2
jax: 0.10.0
libtpu: 0.0.40
codegen_flags: <defaults>
</compile_context>

<pallas_src>
import functools

import jax
import jax.numpy as jnp
from jax.experimental import pallas as pl
from jax.experimental.pallas import tpu as pltpu

_LN_EPS = 1e-5  # PyTorch nn.LayerNorm default


def _tpu_vmem_capacity_bytes():
    try:
        info = pltpu.get_tpu_info()
        cap = int(getattr(info, "vmem_capacity_bytes", 0) or 0)
        if cap > 0:
            return cap
    except Exception:
        pass
    return 64 * 1024 * 1024  # conservative fallback: valid on every generation


_VMEM_CAP = _tpu_vmem_capacity_bytes()
_VMEM_LIMIT = int(max(min(_VMEM_CAP - 16 * 1024 * 1024, 112 * 1024 * 1024),
                      32 * 1024 * 1024))
_ROW_TILE = 256 if _VMEM_CAP <= 64 * 1024 * 1024 else 512


def _mosaic(dims):
    return pltpu.CompilerParams(dimension_semantics=dims,
                                vmem_limit_bytes=_VMEM_LIMIT)


# ------------------------- in-kernel helpers -------------------------

def _layernorm(y, g, b):
    # single-pass mean / E[x^2]  ->  var = E[x^2] - mean^2
    mean = jnp.mean(y, axis=-1, keepdims=True)
    msq = jnp.mean(y * y, axis=-1, keepdims=True)
    var = msq - mean * mean
    yn = (y - mean) * jax.lax.rsqrt(var + _LN_EPS)
    return yn * g + b


def _attend(q, k, v, mask):
    # q, k, v: (S, hd) f32; the 1/sqrt(hd) scale is pre-folded into the Q weights.
    s = jax.lax.dot_general(q.astype(jnp.bfloat16), k.astype(jnp.bfloat16),
                            (((1,), (1,)), ((), ())),
                            preferred_element_type=jnp.float32)
    if mask is not None:
        s = s + mask
    s = s - jnp.max(s, axis=-1, keepdims=True)
    p = jnp.exp(s)
    p = p / jnp.sum(p, axis=-1, keepdims=True)          # exact divide (parity-safe)
    return jnp.dot(p.astype(jnp.bfloat16), v.astype(jnp.bfloat16),
                   preferred_element_type=jnp.float32)
    # TODO(synk): for long S, convert to online-softmax (flash) with q/kv tiling
    # and pack heads so the QK^T contraction reaches K>=128 when hd < 128.


# ------------------------- fused MHA sublayer kernels -------------------------

def _self_attn_sublayer_kernel(x_ref, m_ref, wqkv_ref, bqkv_ref, wo_ref, bo_ref,
                               g_ref, be_ref, o_ref, ctx_ref, *, num_heads):
    # One batch element: QKV proj + per-head attention + out-proj + residual + LN.
    d = o_ref.shape[-1]
    hd = d // num_heads
    x = x_ref[0]                                         # (S, D) f32 residual source
    qkv = (jnp.dot(x.astype(jnp.bfloat16), wqkv_ref[...],
                   preferred_element_type=jnp.float32) + bqkv_ref[...])    # (S, 3D)
    mask = m_ref[...].astype(jnp.float32)
    for h in range(num_heads):                           # static unroll; each head's
        q = qkv[:, h * hd:(h + 1) * hd]                  # result goes straight to the
        k = qkv[:, d + h * hd: d + (h + 1) * hd]         # VMEM ctx scratch (bounded
        v = qkv[:, 2 * d + h * hd: 2 * d + (h + 1) * hd]  # live ranges, no concat)
        ctx_ref[:, h * hd:(h + 1) * hd] = _attend(q, k, v, mask)
    attn = (jnp.dot(ctx_ref[...].astype(jnp.bfloat16), wo_ref[...],
                    preferred_element_type=jnp.float32) + bo_ref[...])
    y = x + attn
    o_ref[0] = _layernorm(y, g_ref[...], be_ref[...]).astype(o_ref.dtype)


def _cross_attn_sublayer_kernel(q_ref, vsrc_ref, wqk_ref, bqk_ref, wv_ref, bv_ref,
                                wo_ref, bo_ref, g_ref, be_ref, o_ref, ctx_ref,
                                *, num_heads):
    # One batch element; q = k = query source (enc), v = separate source (x); no mask.
    d = o_ref.shape[-1]
    hd = d // num_heads
    qs = q_ref[0]                                        # (S, D) residual source
    qk = (jnp.dot(qs.astype(jnp.bfloat16), wqk_ref[...],
                  preferred_element_type=jnp.float32) + bqk_ref[...])      # (S, 2D)
    vp = (jnp.dot(vsrc_ref[0].astype(jnp.bfloat16), wv_ref[...],
                  preferred_element_type=jnp.float32) + bv_ref[...])       # (S, D)
    for h in range(num_heads):
        q = qk[:, h * hd:(h + 1) * hd]
        k = qk[:, d + h * hd: d + (h + 1) * hd]
        v = vp[:, h * hd:(h + 1) * hd]
        ctx_ref[:, h * hd:(h + 1) * hd] = _attend(q, k, v, None)
    attn = (jnp.dot(ctx_ref[...].astype(jnp.bfloat16), wo_ref[...],
                    preferred_element_type=jnp.float32) + bo_ref[...])
    y = qs + attn
    o_ref[0] = _layernorm(y, g_ref[...], be_ref[...]).astype(o_ref.dtype)


def masked_self_attn_sublayer(x_bsd, mask, p):
    """LayerNorm(x + MHA(x, x, x, mask)) — fully fused, one grid step per batch."""
    b, s, d = x_bsd.shape
    kernel = functools.partial(_self_attn_sublayer_kernel, num_heads=p["num_heads"])
    const = lambda i: (0, 0)
    return pl.pallas_call(
        kernel,
        out_shape=jax.ShapeDtypeStruct((b, s, d), x_bsd.dtype),
        grid=(b,),
        in_specs=[pl.BlockSpec((1, s, d), lambda i: (i, 0, 0)),   # x (batch block)
                  pl.BlockSpec((s, s), const),                    # additive mask
                  pl.BlockSpec((d, 3 * d), const),                # fused QKV weight bf16
                  pl.BlockSpec((1, 3 * d), const),
                  pl.BlockSpec((d, d), const),                    # out-proj weight bf16
                  pl.BlockSpec((1, d), const),
                  pl.BlockSpec((1, d), const),                    # ln gamma
                  pl.BlockSpec((1, d), const)],                   # ln beta
        out_specs=pl.BlockSpec((1, s, d), lambda i: (i, 0, 0)),
        scratch_shapes=[pltpu.VMEM((s, d), jnp.float32)],         # ctx scratch
        compiler_params=_mosaic(("parallel",)),
    )(x_bsd, mask, p["w_qkv_t"], p["b_qkv"], p["wo_t"], p["bo"],
      p["ln_g"], p["ln_b"])
    # TODO(synk): for very large D on v7x, column-tile the fused (D, 3D) weight
    # (second grid axis) instead of keeping it fully VMEM resident.


def cross_attn_sublayer(q_bsd, v_bsd, p):
    """LayerNorm(query + MHA(q=query, k=query, v=v)) — the spec's
    (encoder_output, encoder_output, x, None) wiring with residual on query."""
    b, s, d = q_bsd.shape
    kernel = functools.partial(_cross_attn_sublayer_kernel, num_heads=p["num_heads"])
    const = lambda i: (0, 0)
    return pl.pallas_call(
        kernel,
        out_shape=jax.ShapeDtypeStruct((b, s, d), q_bsd.dtype),
        grid=(b,),
        in_specs=[pl.BlockSpec((1, s, d), lambda i: (i, 0, 0)),   # query source (enc)
                  pl.BlockSpec((1, s, d), lambda i: (i, 0, 0)),   # value source (x)
                  pl.BlockSpec((d, 2 * d), const),                # fused Q+K weight bf16
                  pl.BlockSpec((1, 2 * d), const),
                  pl.BlockSpec((d, d), const),                    # V weight bf16
                  pl.BlockSpec((1, d), const),
                  pl.BlockSpec((d, d), const),                    # out-proj weight bf16
                  pl.BlockSpec((1, d), const),
                  pl.BlockSpec((1, d), const),
                  pl.BlockSpec((1, d), const)],
        out_specs=pl.BlockSpec((1, s, d), lambda i: (i, 0, 0)),
        scratch_shapes=[pltpu.VMEM((s, d), jnp.float32)],
        compiler_params=_mosaic(("parallel",)),
    )(q_bsd, v_bsd, p["w_qk_t"], p["b_qk"], p["wv_t"], p["bv"],
      p["wo_t"], p["bo"], p["ln_g"], p["ln_b"])


# ------------------------- FFN sublayer (DFF-tiled) -------------------------

def _ffn_kernel(x_ref, w1_ref, b1_ref, w2_ref, b2_ref, g_ref, be_ref, o_ref,
                acc_ref):
    # y = LayerNorm(x + GELU(x @ W1 + b1) @ W2 + b2); W1/W2 stream in DFF K-tiles.
    k = pl.program_id(1)

    @pl.when(k == 0)
    def _():
        acc_ref[...] = jnp.zeros_like(acc_ref)

    xb = x_ref[...].astype(jnp.bfloat16)
    h = (jnp.dot(xb, w1_ref[...], preferred_element_type=jnp.float32)
         + b1_ref[...])
    h = 0.5 * h * (1.0 + jax.lax.erf(h * 0.7071067811865476))   # exact erf GELU
    acc_ref[...] += jnp.dot(h.astype(jnp.bfloat16), w2_ref[...],
                            preferred_element_type=jnp.float32)

    @pl.when(k == pl.num_programs(1) - 1)
    def _():
        y = x_ref[...].astype(jnp.float32) + acc_ref[...] + b2_ref[...]
        o_ref[...] = _layernorm(y, g_ref[...], be_ref[...]).astype(o_ref.dtype)


def _dff_tile(dff):
    for t in (512, 256, 128):
        if dff > t and dff % t == 0:
            return t
    return dff


def ffn_sublayer(x_bsd, p):
    b, s, d = x_bsd.shape
    n = b * s
    x2 = x_bsd.reshape(n, d)
    dff = p["w1_t"].shape[1]
    tdff = _dff_tile(dff)
    tm = n if n <= _ROW_TILE else _ROW_TILE
    n_pad = (n + tm - 1) // tm * tm
    if n_pad != n:                # only when B*S is not a multiple of the row tile
        x2 = jnp.pad(x2, ((0, n_pad - n), (0, 0)))
    const = lambda i, k: (0, 0)
    y = pl.pallas_call(
        _ffn_kernel,
        out_shape=jax.ShapeDtypeStruct((n_pad, d), x_bsd.dtype),
        grid=(n_pad // tm, dff // tdff),
        in_specs=[pl.BlockSpec((tm, d), lambda i, k: (i, 0)),     # x row tile
                  pl.BlockSpec((d, tdff), lambda i, k: (0, k)),   # W1 K-tile bf16
                  pl.BlockSpec((1, tdff), lambda i, k: (0, k)),   # b1 K-tile
                  pl.BlockSpec((tdff, d), lambda i, k: (k, 0)),   # W2 K-tile bf16
                  pl.BlockSpec((1, d), const),                    # b2
                  pl.BlockSpec((1, d), const),                    # ln gamma
                  pl.BlockSpec((1, d), const)],                   # ln beta
        out_specs=pl.BlockSpec((tm, d), lambda i, k: (i, 0)),
        scratch_shapes=[pltpu.VMEM((tm, d), jnp.float32)],        # f32 accumulator
        compiler_params=_mosaic(("parallel", "arbitrary")),
    )(x2, p["w1_t"], p["b1"], p["w2_t"], p["b2"], p["ln_g"], p["ln_b"])
    if n_pad != n:
        y = y[:n]
    # TODO(synk): nn.Dropout after the final LayerNorm is identity in eval; omitted.
    return y.reshape(b, s, d)


# ------------------------- decoder layer -------------------------

def decoder_layer(encoder_output, decoder_input, attn_mask, params):
    # Inputs follow the PyTorch (seq, batch, d_model) convention (batch_first=False);
    # convert once to batch-first so no per-sublayer transposes hit HBM.
    enc = jnp.transpose(encoder_output, (1, 0, 2))
    dec = jnp.transpose(decoder_input, (1, 0, 2))
    x = masked_self_attn_sublayer(dec, attn_mask, params["masked_mha"])
    x = cross_attn_sublayer(enc, x, params["mha"])   # q=k=enc, v=x, no mask (spec)
    x = ffn_sublayer(x, params["ffn"])
    return jnp.transpose(x, (1, 0, 2))               # back to (seq, batch, d_model)


# ------------------------- deterministic parameter init -------------------------

def init_params(key, d_model, num_heads, d_ffn):
    ks = jax.random.split(key, 10)
    hd = d_model // num_heads
    scale = 1.0 / float(hd) ** 0.5

    def mha_raw(k_in_w, k_in_b, k_out_w):
        in_w = 0.05 * jax.random.normal(k_in_w, (3 * d_model, d_model), jnp.float32)
        in_b = 0.05 * jax.random.normal(k_in_b, (3 * d_model,), jnp.float32)
        out_w = 0.05 * jax.random.normal(k_out_w, (d_model, d_model), jnp.float32)
        out_b = jnp.zeros((d_model,), jnp.float32)
        wq, wk, wv = jnp.split(in_w, 3, axis=0)
        bq, bk, bv = jnp.split(in_b, 3, axis=0)
        # Fold the 1/sqrt(head_dim) softmax scale into the Q projection (weight+bias).
        wq = wq * scale
        bq = bq * scale
        common = {
            "num_heads": num_heads,
            "wo_t": out_w.T.astype(jnp.bfloat16), "bo": out_b.reshape(1, -1),
            "ln_g": jnp.ones((1, d_model), jnp.float32),
            "ln_b": jnp.zeros((1, d_model), jnp.float32),
        }
        return wq, wk, wv, bq, bk, bv, common

    # masked self-attention: fused QKV weight (D, 3D), bf16
    wq, wk, wv, bq, bk, bv, common = mha_raw(ks[0], ks[1], ks[2])
    masked_mha = dict(common)
    masked_mha["w_qkv_t"] = jnp.concatenate([wq.T, wk.T, wv.T],
                                            axis=1).astype(jnp.bfloat16)
    masked_mha["b_qkv"] = jnp.concatenate([bq, bk, bv]).reshape(1, -1)

    # cross-attention: fused Q+K weight (D, 2D) (shared source), separate V
    wq, wk, wv, bq, bk, bv, common = mha_raw(ks[3], ks[4], ks[5])
    mha = dict(common)
    mha["w_qk_t"] = jnp.concatenate([wq.T, wk.T], axis=1).astype(jnp.bfloat16)
    mha["b_qk"] = jnp.concatenate([bq, bk]).reshape(1, -1)
    mha["wv_t"] = wv.T.astype(jnp.bfloat16)
    mha["bv"] = bv.reshape(1, -1)

    w1 = 0.05 * jax.random.normal(ks[6], (d_ffn, d_model), jnp.float32)
    b1 = 0.05 * jax.random.normal(ks[7], (d_ffn,), jnp.float32)
    w2 = 0.05 * jax.random.normal(ks[8], (d_model, d_ffn), jnp.float32)
    b2 = 0.05 * jax.random.normal(ks[9], (d_model,), jnp.float32)
    ffn = {
        "w1_t": w1.T.astype(jnp.bfloat16), "b1": b1.reshape(1, -1),
        "w2_t": w2.T.astype(jnp.bfloat16), "b2": b2.reshape(1, -1),
        "ln_g": jnp.ones((1, d_model), jnp.float32),
        "ln_b": jnp.zeros((1, d_model), jnp.float32),
    }
    return {"masked_mha": masked_mha, "mha": mha, "ffn": ffn}


# ------------------------- driver -------------------------

if __name__ == "__main__":
    S, B, D, H, DFF = 8, 2, 32, 4, 64

    key = jax.random.PRNGKey(0)
    k_enc, k_dec, k_par = jax.random.split(key, 3)

    # (seq, batch, d_model) — PyTorch nn.MultiheadAttention default (batch_first=False)
    encoder_output = jax.random.normal(k_enc, (S, B, D), jnp.float32)
    decoder_input = jax.random.normal(k_dec, (S, B, D), jnp.float32)

    # additive causal mask (S, S): 0 on/below diagonal, large negative above
    causal = jnp.tril(jnp.ones((S, S), jnp.float32))
    attn_mask = jnp.where(causal > 0, 0.0, -1e9).astype(jnp.float32)

    params = init_params(k_par, D, H, DFF)

    fwd = jax.jit(lambda e, d, m: decoder_layer(e, d, m, params))
    out = jax.block_until_ready(fwd(encoder_output, decoder_input, attn_mask))
    assert out.shape == (S, B, D)
    assert bool(jnp.all(jnp.isfinite(out)))
    print("KERNEL_OK")
</pallas_src>

<mosaic_0001>
module attributes {stable_mosaic.version = 11 : i64} {
  func.func @_self_attn_sublayer_kernel(%arg0: i32, %arg1: memref<1x8x32xf32, #tpu.memory_space<vmem>>, %arg2: memref<8x8xf32, #tpu.memory_space<vmem>>, %arg3: memref<32x96xbf16, #tpu.memory_space<vmem>>, %arg4: memref<1x96xf32, #tpu.memory_space<vmem>>, %arg5: memref<32x32xbf16, #tpu.memory_space<vmem>>, %arg6: memref<1x32xf32, #tpu.memory_space<vmem>>, %arg7: memref<1x32xf32, #tpu.memory_space<vmem>>, %arg8: memref<1x32xf32, #tpu.memory_space<vmem>>, %arg9: memref<1x8x32xf32, #tpu.memory_space<vmem>>, %arg10: memref<8x32xf32, #tpu.memory_space<vmem>>) attributes {dimension_semantics = [#tpu.dimension_semantics<parallel>], iteration_bounds = array<i64: 2>, scalar_prefetch = 0 : i64, scratch_operands = 1 : i64, tpu.core_type = #tpu.core_type<tc>, window_params = [{transform_indices = @transform_0, window_bounds = array<i64: 1, 8, 32>}, {pipeline_mode = #tpu.pipeline_mode<synchronous>, transform_indices = @transform_1, window_bounds = array<i64: 8, 8>}, {pipeline_mode = #tpu.pipeline_mode<synchronous>, transform_indices = @transform_2, window_bounds = array<i64: 32, 96>}, {pipeline_mode = #tpu.pipeline_mode<synchronous>, transform_indices = @transform_3, window_bounds = array<i64: 1, 96>}, {pipeline_mode = #tpu.pipeline_mode<synchronous>, transform_indices = @transform_4, window_bounds = array<i64: 32, 32>}, {pipeline_mode = #tpu.pipeline_mode<synchronous>, transform_indices = @transform_5, window_bounds = array<i64: 1, 32>}, {pipeline_mode = #tpu.pipeline_mode<synchronous>, transform_indices = @transform_6, window_bounds = array<i64: 1, 32>}, {pipeline_mode = #tpu.pipeline_mode<synchronous>, transform_indices = @transform_7, window_bounds = array<i64: 1, 32>}, {transform_indices = @transform_8, window_bounds = array<i64: 1, 8, 32>}]} {
    %c0 = arith.constant 0 : index
    %c0_0 = arith.constant 0 : index
    %c0_1 = arith.constant 0 : index
    %0 = vector.load %arg1[%c0, %c0_0, %c0_1] : memref<1x8x32xf32, #tpu.memory_space<vmem>>, vector<1x8x32xf32>
    %1 = vector.shape_cast %0 : vector<1x8x32xf32> to vector<8x32xf32>
    %2 = arith.truncf %1 : vector<8x32xf32> to vector<8x32xbf16>
    %c0_2 = arith.constant 0 : index
    %c0_3 = arith.constant 0 : index
    %3 = vector.load %arg3[%c0_2, %c0_3] : memref<32x96xbf16, #tpu.memory_space<vmem>>, vector<32x96xbf16>
    %cst = arith.constant dense<0.000000e+00> : vector<8x96xf32>
    %4 = tpu.matmul %2, %3, %cst {dimension_numbers = #tpu.dot_dimension_numbers<[1], [0], [0], [1], [0, 0, 1, 1], [], []>} : vector<8x32xbf16>, vector<32x96xbf16>, vector<8x96xf32> -> vector<8x96xf32>
    %c0_4 = arith.constant 0 : index
    %c0_5 = arith.constant 0 : index
    %5 = vector.load %arg4[%c0_4, %c0_5] : memref<1x96xf32, #tpu.memory_space<vmem>>, vector<1x96xf32>
    %6 = vector.broadcast %5 : vector<1x96xf32> to vector<8x96xf32>
    %7 = arith.addf %4, %6 : vector<8x96xf32>
    %c0_6 = arith.constant 0 : index
    %c0_7 = arith.constant 0 : index
    %8 = vector.load %arg2[%c0_6, %c0_7] : memref<8x8xf32, #tpu.memory_space<vmem>>, vector<8x8xf32>
    %9 = vector.extract_strided_slice %7 {offsets = [0, 0], sizes = [8, 8], strides = [1, 1]} : vector<8x96xf32> to vector<8x8xf32>
    %10 = vector.extract_strided_slice %7 {offsets = [0, 32], sizes = [8, 8], strides = [1, 1]} : vector<8x96xf32> to vector<8x8xf32>
    %11 = vector.extract_strided_slice %7 {offsets = [0, 64], sizes = [8, 8], strides = [1, 1]} : vector<8x96xf32> to vector<8x8xf32>
    %12 = arith.truncf %9 : vector<8x8xf32> to vector<8x8xbf16>
    %13 = arith.truncf %10 : vector<8x8xf32> to vector<8x8xbf16>
    %cst_8 = arith.constant dense<0.000000e+00> : vector<8x8xf32>
    %14 = tpu.matmul %12, %13, %cst_8 {dimension_numbers = #tpu.dot_dimension_numbers<[1], [1], [0], [0], [0, 0, 1, 0], [], []>} : vector<8x8xbf16>, vector<8x8xbf16>, vector<8x8xf32> -> vector<8x8xf32>
    %15 = arith.addf %14, %8 : vector<8x8xf32>
    %cst_9 = arith.constant dense<0xFF800000> : vector<8xf32>
    %16 = vector.multi_reduction <maximumf>, %15, %cst_9 [1] : vector<8x8xf32> to vector<8xf32>
    %17 = vector.shape_cast %16 : vector<8xf32> to vector<8x1xf32>
    %18 = vector.broadcast %17 : vector<8x1xf32> to vector<8x8xf32>
    %19 = arith.subf %15, %18 : vector<8x8xf32>
    %20 = math.exp %19 : vector<8x8xf32>
    %cst_10 = arith.constant dense<0.000000e+00> : vector<8xf32>
    %21 = vector.multi_reduction <add>, %20, %cst_10 [1] : vector<8x8xf32> to vector<8xf32>
    %22 = vector.shape_cast %21 : vector<8xf32> to vector<8x1xf32>
    %23 = vector.broadcast %22 : vector<8x1xf32> to vector<8x8xf32>
    %24 = arith.divf %20, %23 : vector<8x8xf32>
    %25 = arith.truncf %24 : vector<8x8xf32> to vector<8x8xbf16>
    %26 = arith.truncf %11 : vector<8x8xf32> to vector<8x8xbf16>
    %cst_11 = arith.constant dense<0.000000e+00> : vector<8x8xf32>
    %27 = tpu.matmul %25, %26, %cst_11 {dimension_numbers = #tpu.dot_dimension_numbers<[1], [0], [0], [1], [0, 0, 1, 1], [], []>} : vector<8x8xbf16>, vector<8x8xbf16>, vector<8x8xf32> -> vector<8x8xf32>
    %c0_12 = arith.constant 0 : index
    %c0_13 = arith.constant 0 : index
    %28 = vector.load %arg10[%c0_12, %c0_13] : memref<8x32xf32, #tpu.memory_space<vmem>>, vector<8x8xf32>
    tpu.vector_store %arg10[%c0_12, %c0_13], %27 {strides = array<i32>} : memref<8x32xf32, #tpu.memory_space<vmem>>, vector<8x8xf32>,
    %29 = vector.extract_strided_slice %7 {offsets = [0, 8], sizes = [8, 8], strides = [1, 1]} : vector<8x96xf32> to vector<8x8xf32>
    %30 = vector.extract_strided_slice %7 {offsets = [0, 40], sizes = [8, 8], strides = [1, 1]} : vector<8x96xf32> to vector<8x8xf32>
    %31 = vector.extract_strided_slice %7 {offsets = [0, 72], sizes = [8, 8], strides = [1, 1]} : vector<8x96xf32> to vector<8x8xf32>
    %32 = arith.truncf %29 : vector<8x8xf32> to vector<8x8xbf16>
    %33 = arith.truncf %30 : vector<8x8xf32> to vector<8x8xbf16>
    %cst_14 = arith.constant dense<0.000000e+00> : vector<8x8xf32>
    %34 = tpu.matmul %32, %33, %cst_14 {dimension_numbers = #tpu.dot_dimension_numbers<[1], [1], [0], [0], [0, 0, 1, 0], [], []>} : vector<8x8xbf16>, vector<8x8xbf16>, vector<8x8xf32> -> vector<8x8xf32>
    %35 = arith.addf %34, %8 : vector<8x8xf32>
    %cst_15 = arith.constant dense<0xFF800000> : vector<8xf32>
    %36 = vector.multi_reduction <maximumf>, %35, %cst_15 [1] : vector<8x8xf32> to vector<8xf32>
    %37 = vector.shape_cast %36 : vector<8xf32> to vector<8x1xf32>
    %38 = vector.broadcast %37 : vector<8x1xf32> to vector<8x8xf32>
    %39 = arith.subf %35, %38 : vector<8x8xf32>
    %40 = math.exp %39 : vector<8x8xf32>
    %cst_16 = arith.constant dense<0.000000e+00> : vector<8xf32>
    %41 = vector.multi_reduction <add>, %40, %cst_16 [1] : vector<8x8xf32> to vector<8xf32>
    %42 = vector.shape_cast %41 : vector<8xf32> to vector<8x1xf32>
    %43 = vector.broadcast %42 : vector<8x1xf32> to vector<8x8xf32>
    %44 = arith.divf %40, %43 : vector<8x8xf32>
    %45 = arith.truncf %44 : vector<8x8xf32> to vector<8x8xbf16>
    %46 = arith.truncf %31 : vector<8x8xf32> to vector<8x8xbf16>
    %cst_17 = arith.constant dense<0.000000e+00> : vector<8x8xf32>
    %47 = tpu.matmul %45, %46, %cst_17 {dimension_numbers = #tpu.dot_dimension_numbers<[1], [0], [0], [1], [0, 0, 1, 1], [], []>} : vector<8x8xbf16>, vector<8x8xbf16>, vector<8x8xf32> -> vector<8x8xf32>
    %c0_18 = arith.constant 0 : index
    %c8 = arith.constant 8 : index
    %48 = vector.load %arg10[%c0_18, %c8] : memref<8x32xf32, #tpu.memory_space<vmem>>, vector<8x8xf32>
    tpu.vector_store %arg10[%c0_18, %c8], %47 {strides = array<i32>} : memref<8x32xf32, #tpu.memory_space<vmem>>, vector<8x8xf32>,
    %49 = vector.extract_strided_slice %7 {offsets = [0, 16], sizes = [8, 8], strides = [1, 1]} : vector<8x96xf32> to vector<8x8xf32>
    %50 = vector.extract_strided_slice %7 {offsets = [0, 48], sizes = [8, 8], strides = [1, 1]} : vector<8x96xf32> to vector<8x8xf32>
    %51 = vector.extract_strided_slice %7 {offsets = [0, 80], sizes = [8, 8], strides = [1, 1]} : vector<8x96xf32> to vector<8x8xf32>
    %52 = arith.truncf %49 : vector<8x8xf32> to vector<8x8xbf16>
    %53 = arith.truncf %50 : vector<8x8xf32> to vector<8x8xbf16>
    %cst_19 = arith.constant dense<0.000000e+00> : vector<8x8xf32>
    %54 = tpu.matmul %52, %53, %cst_19 {dimension_numbers = #tpu.dot_dimension_numbers<[1], [1], [0], [0], [0, 0, 1, 0], [], []>} : vector<8x8xbf16>, vector<8x8xbf16>, vector<8x8xf32> -> vector<8x8xf32>
    %55 = arith.addf %54, %8 : vector<8x8xf32>
    %cst_20 = arith.constant dense<0xFF800000> : vector<8xf32>
    %56 = vector.multi_reduction <maximumf>, %55, %cst_20 [1] : vector<8x8xf32> to vector<8xf32>
    %57 = vector.shape_cast %56 : vector<8xf32> to vector<8x1xf32>
    %58 = vector.broadcast %57 : vector<8x1xf32> to vector<8x8xf32>
    %59 = arith.subf %55, %58 : vector<8x8xf32>
    %60 = math.exp %59 : vector<8x8xf32>
    %cst_21 = arith.constant dense<0.000000e+00> : vector<8xf32>
    %61 = vector.multi_reduction <add>, %60, %cst_21 [1] : vector<8x8xf32> to vector<8xf32>
    %62 = vector.shape_cast %61 : vector<8xf32> to vector<8x1xf32>
    %63 = vector.broadcast %62 : vector<8x1xf32> to vector<8x8xf32>
    %64 = arith.divf %60, %63 : vector<8x8xf32>
    %65 = arith.truncf %64 : vector<8x8xf32> to vector<8x8xbf16>
    %66 = arith.truncf %51 : vector<8x8xf32> to vector<8x8xbf16>
    %cst_22 = arith.constant dense<0.000000e+00> : vector<8x8xf32>
    %67 = tpu.matmul %65, %66, %cst_22 {dimension_numbers = #tpu.dot_dimension_numbers<[1], [0], [0], [1], [0, 0, 1, 1], [], []>} : vector<8x8xbf16>, vector<8x8xbf16>, vector<8x8xf32> -> vector<8x8xf32>
    %c0_23 = arith.constant 0 : index
    %c16 = arith.constant 16 : index
    %68 = vector.load %arg10[%c0_23, %c16] : memref<8x32xf32, #tpu.memory_space<vmem>>, vector<8x8xf32>
    tpu.vector_store %arg10[%c0_23, %c16], %67 {strides = array<i32>} : memref<8x32xf32, #tpu.memory_space<vmem>>, vector<8x8xf32>,
    %69 = vector.extract_strided_slice %7 {offsets = [0, 24], sizes = [8, 8], strides = [1, 1]} : vector<8x96xf32> to vector<8x8xf32>
    %70 = vector.extract_strided_slice %7 {offsets = [0, 56], sizes = [8, 8], strides = [1, 1]} : vector<8x96xf32> to vector<8x8xf32>
    %71 = vector.extract_strided_slice %7 {offsets = [0, 88], sizes = [8, 8], strides = [1, 1]} : vector<8x96xf32> to vector<8x8xf32>
    %72 = arith.truncf %69 : vector<8x8xf32> to vector<8x8xbf16>
    %73 = arith.truncf %70 : vector<8x8xf32> to vector<8x8xbf16>
    %cst_24 = arith.constant dense<0.000000e+00> : vector<8x8xf32>
    %74 = tpu.matmul %72, %73, %cst_24 {dimension_numbers = #tpu.dot_dimension_numbers<[1], [1], [0], [0], [0, 0, 1, 0], [], []>} : vector<8x8xbf16>, vector<8x8xbf16>, vector<8x8xf32> -> vector<8x8xf32>
    %75 = arith.addf %74, %8 : vector<8x8xf32>
    %cst_25 = arith.constant dense<0xFF800000> : vector<8xf32>
    %76 = vector.multi_reduction <maximumf>, %75, %cst_25 [1] : vector<8x8xf32> to vector<8xf32>
    %77 = vector.shape_cast %76 : vector<8xf32> to vector<8x1xf32>
    %78 = vector.broadcast %77 : vector<8x1xf32> to vector<8x8xf32>
    %79 = arith.subf %75, %78 : vector<8x8xf32>
    %80 = math.exp %79 : vector<8x8xf32>
    %cst_26 = arith.constant dense<0.000000e+00> : vector<8xf32>
    %81 = vector.multi_reduction <add>, %80, %cst_26 [1] : vector<8x8xf32> to vector<8xf32>
    %82 = vector.shape_cast %81 : vector<8xf32> to vector<8x1xf32>
    %83 = vector.broadcast %82 : vector<8x1xf32> to vector<8x8xf32>
    %84 = arith.divf %80, %83 : vector<8x8xf32>
    %85 = arith.truncf %84 : vector<8x8xf32> to vector<8x8xbf16>
    %86 = arith.truncf %71 : vector<8x8xf32> to vector<8x8xbf16>
    %cst_27 = arith.constant dense<0.000000e+00> : vector<8x8xf32>
    %87 = tpu.matmul %85, %86, %cst_27 {dimension_numbers = #tpu.dot_dimension_numbers<[1], [0], [0], [1], [0, 0, 1, 1], [], []>} : vector<8x8xbf16>, vector<8x8xbf16>, vector<8x8xf32> -> vector<8x8xf32>
    %c0_28 = arith.constant 0 : index
    %c24 = arith.constant 24 : index
    %88 = vector.load %arg10[%c0_28, %c24] : memref<8x32xf32, #tpu.memory_space<vmem>>, vector<8x8xf32>
    tpu.vector_store %arg10[%c0_28, %c24], %87 {strides = array<i32>} : memref<8x32xf32, #tpu.memory_space<vmem>>, vector<8x8xf32>,
    %c0_29 = arith.constant 0 : index
    %c0_30 = arith.constant 0 : index
    %89 = vector.load %arg10[%c0_29, %c0_30] : memref<8x32xf32, #tpu.memory_space<vmem>>, vector<8x32xf32>
    %90 = arith.truncf %89 : vector<8x32xf32> to vector<8x32xbf16>
    %c0_31 = arith.constant 0 : index
    %c0_32 = arith.constant 0 : index
    %91 = vector.load %arg5[%c0_31, %c0_32] : memref<32x32xbf16, #tpu.memory_space<vmem>>, vector<32x32xbf16>
    %cst_33 = arith.constant dense<0.000000e+00> : vector<8x32xf32>
    %92 = tpu.matmul %90, %91, %cst_33 {dimension_numbers = #tpu.dot_dimension_numbers<[1], [0], [0], [1], [0, 0, 1, 1], [], []>} : vector<8x32xbf16>, vector<32x32xbf16>, vector<8x32xf32> -> vector<8x32xf32>
    %c0_34 = arith.constant 0 : index
    %c0_35 = arith.constant 0 : index
    %93 = vector.load %arg6[%c0_34, %c0_35] : memref<1x32xf32, #tpu.memory_space<vmem>>, vector<1x32xf32>
    %94 = vector.broadcast %93 : vector<1x32xf32> to vector<8x32xf32>
    %95 = arith.addf %92, %94 : vector<8x32xf32>
    %96 = arith.addf %1, %95 : vector<8x32xf32>
    %c0_36 = arith.constant 0 : index
    %c0_37 = arith.constant 0 : index
    %97 = vector.load %arg7[%c0_36, %c0_37] : memref<1x32xf32, #tpu.memory_space<vmem>>, vector<1x32xf32>
    %c0_38 = arith.constant 0 : index
    %c0_39 = arith.constant 0 : index
    %98 = vector.load %arg8[%c0_38, %c0_39] : memref<1x32xf32, #tpu.memory_space<vmem>>, vector<1x32xf32>
    %cst_40 = arith.constant dense<0.000000e+00> : vector<8xf32>
    %99 = vector.multi_reduction <add>, %96, %cst_40 [1] : vector<8x32xf32> to vector<8xf32>
    %100 = vector.shape_cast %99 : vector<8xf32> to vector<8x1xf32>
    %cst_41 = arith.constant 3.200000e+01 : f32
    %101 = vector.broadcast %cst_41 : f32 to vector<8x1xf32>
    %102 = arith.divf %100, %101 : vector<8x1xf32>
    %103 = arith.mulf %96, %96 : vector<8x32xf32>
    %cst_42 = arith.constant dense<0.000000e+00> : vector<8xf32>
    %104 = vector.multi_reduction <add>, %103, %cst_42 [1] : vector<8x32xf32> to vector<8xf32>
    %105 = vector.shape_cast %104 : vector<8xf32> to vector<8x1xf32>
    %cst_43 = arith.constant 3.200000e+01 : f32
    %106 = vector.broadcast %cst_43 : f32 to vector<8x1xf32>
    %107 = arith.divf %105, %106 : vector<8x1xf32>
    %108 = arith.mulf %102, %102 : vector<8x1xf32>
    %109 = arith.subf %107, %108 : vector<8x1xf32>
    %110 = vector.broadcast %102 : vector<8x1xf32> to vector<8x32xf32>
    %111 = arith.subf %96, %110 : vector<8x32xf32>
    %cst_44 = arith.constant 9.99999974E-6 : f32
    %112 = vector.broadcast %cst_44 : f32 to vector<8x1xf32>
    %113 = arith.addf %109, %112 : vector<8x1xf32>
    %114 = math.rsqrt %113 : vector<8x1xf32>
    %115 = vector.broadcast %114 : vector<8x1xf32> to vector<8x32xf32>
    %116 = arith.mulf %111, %115 : vector<8x32xf32>
    %117 = vector.broadcast %97 : vector<1x32xf32> to vector<8x32xf32>
    %118 = arith.mulf %116, %117 : vector<8x32xf32>
    %119 = vector.broadcast %98 : vector<1x32xf32> to vector<8x32xf32>
    %120 = arith.addf %118, %119 : vector<8x32xf32>
    %c0_45 = arith.constant 0 : index
    %c0_46 = arith.constant 0 : index
    %c0_47 = arith.constant 0 : index
    %121 = vector.load %arg9[%c0_45, %c0_46, %c0_47] : memref<1x8x32xf32, #tpu.memory_space<vmem>>, vector<1x8x32xf32>
    %122 = vector.shape_cast %121 : vector<1x8x32xf32> to vector<8x32xf32>
    %123 = vector.shape_cast %120 : vector<8x32xf32> to vector<1x8x32xf32>
    tpu.vector_store %arg9[%c0_45, %c0_46, %c0_47], %123 {strides = array<i32>} : memref<1x8x32xf32, #tpu.memory_space<vmem>>, vector<1x8x32xf32>,
    return
  }
  func.func @transform_0(%arg0: i32) -> (i32, i32, i32) {
    %c0_i32 = arith.constant 0 : i32
    %c0_i32_0 = arith.constant 0 : i32
    %c0_i32_1 = arith.constant 0 : i32
    return %arg0, %c0_i32, %c0_i32_0 : i32, i32, i32
  }
  func.func @transform_1(%arg0: i32) -> (i32, i32) {
    %c0_i32 = arith.constant 0 : i32
    %c0_i32_0 = arith.constant 0 : i32
    %c0_i32_1 = arith.constant 0 : i32
    return %c0_i32, %c0_i32_0 : i32, i32
  }
  func.func @transform_2(%arg0: i32) -> (i32, i32) {
    %c0_i32 = arith.constant 0 : i32
    %c0_i32_0 = arith.constant 0 : i32
    %c0_i32_1 = arith.constant 0 : i32
    return %c0_i32, %c0_i32_0 : i32, i32
  }
  func.func @transform_3(%arg0: i32) -> (i32, i32) {
    %c0_i32 = arith.constant 0 : i32
    %c0_i32_0 = arith.constant 0 : i32
    %c0_i32_1 = arith.constant 0 : i32
    return %c0_i32, %c0_i32_0 : i32, i32
  }
  func.func @transform_4(%arg0: i32) -> (i32, i32) {
    %c0_i32 = arith.constant 0 : i32
    %c0_i32_0 = arith.constant 0 : i32
    %c0_i32_1 = arith.constant 0 : i32
    return %c0_i32, %c0_i32_0 : i32, i32
  }
  func.func @transform_5(%arg0: i32) -> (i32, i32) {
    %c0_i32 = arith.constant 0 : i32
    %c0_i32_0 = arith.constant 0 : i32
    %c0_i32_1 = arith.constant 0 : i32
    return %c0_i32, %c0_i32_0 : i32, i32
  }
  func.func @transform_6(%arg0: i32) -> (i32, i32) {
    %c0_i32 = arith.constant 0 : i32
    %c0_i32_0 = arith.constant 0 : i32
    %c0_i32_1 = arith.constant 0 : i32
    return %c0_i32, %c0_i32_0 : i32, i32
  }
  func.func @transform_7(%arg0: i32) -> (i32, i32) {
    %c0_i32 = arith.constant 0 : i32
    %c0_i32_0 = arith.constant 0 : i32
    %c0_i32_1 = arith.constant 0 : i32
    return %c0_i32, %c0_i32_0 : i32, i32
  }
  func.func @transform_8(%arg0: i32) -> (i32, i32, i32) {
    %c0_i32 = arith.constant 0 : i32
    %c0_i32_0 = arith.constant 0 : i32
    %c0_i32_1 = arith.constant 0 : i32
    return %arg0, %c0_i32, %c0_i32_0 : i32, i32, i32
  }
}

module attributes {stable_mosaic.version = 11 : i64} {
  func.func @_ffn_kernel(%arg0: i32, %arg1: i32, %arg2: memref<16x32xf32, #tpu.memory_space<vmem>>, %arg3: memref<32x64xbf16, #tpu.memory_space<vmem>>, %arg4: memref<1x64xf32, #tpu.memory_space<vmem>>, %arg5: memref<64x32xbf16, #tpu.memory_space<vmem>>, %arg6: memref<1x32xf32, #tpu.memory_space<vmem>>, %arg7: memref<1x32xf32, #tpu.memory_space<vmem>>, %arg8: memref<1x32xf32, #tpu.memory_space<vmem>>, %arg9: memref<16x32xf32, #tpu.memory_space<vmem>>, %arg10: memref<16x32xf32, #tpu.memory_space<vmem>>) attributes {dimension_semantics = [#tpu.dimension_semantics<parallel>, #tpu.dimension_semantics<arbitrary>], iteration_bounds = array<i64: 1, 1>, scalar_prefetch = 0 : i64, scratch_operands = 1 : i64, tpu.core_type = #tpu.core_type<tc>, window_params = [{transform_indices = @transform_0, window_bounds = array<i64: 16, 32>}, {transform_indices = @transform_1, window_bounds = array<i64: 32, 64>}, {transform_indices = @transform_2, window_bounds = array<i64: 1, 64>}, {transform_indices = @transform_3, window_bounds = array<i64: 64, 32>}, {pipeline_mode = #tpu.pipeline_mode<synchronous>, transform_indices = @transform_4, window_bounds = array<i64: 1, 32>}, {pipeline_mode = #tpu.pipeline_mode<synchronous>, transform_indices = @transform_5, window_bounds = array<i64: 1, 32>}, {pipeline_mode = #tpu.pipeline_mode<synchronous>, transform_indices = @transform_6, window_bounds = array<i64: 1, 32>}, {transform_indices = @transform_7, window_bounds = array<i64: 16, 32>}]} {
    %c0_i32 = arith.constant 0 : i32
    %0 = arith.cmpi eq, %arg1, %c0_i32 : i32
    %1 = arith.extui %0 : i1 to i32
    %c0_i32_0 = arith.constant 0 : i32
    %2 = arith.cmpi ne, %1, %c0_i32_0 : i32
    scf.if %2 {
      %cst_18 = arith.constant 0.000000e+00 : f32
      %27 = vector.broadcast %cst_18 : f32 to vector<16x32xf32>
      %c0_19 = arith.constant 0 : index
      %c0_20 = arith.constant 0 : index
      %28 = vector.load %arg10[%c0_19, %c0_20] : memref<16x32xf32, #tpu.memory_space<vmem>>, vector<16x32xf32>
      tpu.vector_store %arg10[%c0_19, %c0_20], %27 {strides = array<i32>} : memref<16x32xf32, #tpu.memory_space<vmem>>, vector<16x32xf32>,
    } else {
    }
    %c0 = arith.constant 0 : index
    %c0_1 = arith.constant 0 : index
    %3 = vector.load %arg2[%c0, %c0_1] : memref<16x32xf32, #tpu.memory_space<vmem>>, vector<16x32xf32>
    %4 = arith.truncf %3 : vector<16x32xf32> to vector<16x32xbf16>
    %c0_2 = arith.constant 0 : index
    %c0_3 = arith.constant 0 : index
    %5 = vector.load %arg3[%c0_2, %c0_3] : memref<32x64xbf16, #tpu.memory_space<vmem>>, vector<32x64xbf16>
    %cst = arith.constant dense<0.000000e+00> : vector<16x64xf32>
    %6 = tpu.matmul %4, %5, %cst {dimension_numbers = #tpu.dot_dimension_numbers<[1], [0], [0], [1], [0, 0, 1, 1], [], []>} : vector<16x32xbf16>, vector<32x64xbf16>, vector<16x64xf32> -> vector<16x64xf32>
    %c0_4 = arith.constant 0 : index
    %c0_5 = arith.constant 0 : index
    %7 = vector.load %arg4[%c0_4, %c0_5] : memref<1x64xf32, #tpu.memory_space<vmem>>, vector<1x64xf32>
    %8 = vector.broadcast %7 : vector<1x64xf32> to vector<16x64xf32>
    %9 = arith.addf %6, %8 : vector<16x64xf32>
    %cst_6 = arith.constant 5.000000e-01 : f32
    %10 = vector.broadcast %cst_6 : f32 to vector<16x64xf32>
    %11 = arith.mulf %10, %9 : vector<16x64xf32>
    %cst_7 = arith.constant 0.707106769 : f32
    %12 = vector.broadcast %cst_7 : f32 to vector<16x64xf32>
    %13 = arith.mulf %9, %12 : vector<16x64xf32>
    %14 = math.erf %13 : vector<16x64xf32>
    %cst_8 = arith.constant 1.000000e+00 : f32
    %15 = vector.broadcast %cst_8 : f32 to vector<16x64xf32>
    %16 = arith.addf %15, %14 : vector<16x64xf32>
    %17 = arith.mulf %11, %16 : vector<16x64xf32>
    %c0_9 = arith.constant 0 : index
    %c0_10 = arith.constant 0 : index
    %18 = vector.load %arg10[%c0_9, %c0_10] : memref<16x32xf32, #tpu.memory_space<vmem>>, vector<16x32xf32>
    %19 = arith.truncf %17 : vector<16x64xf32> to vector<16x64xbf16>
    %c0_11 = arith.constant 0 : index
    %c0_12 = arith.constant 0 : index
    %20 = vector.load %arg5[%c0_11, %c0_12] : memref<64x32xbf16, #tpu.memory_space<vmem>>, vector<64x32xbf16>
    %cst_13 = arith.constant dense<0.000000e+00> : vector<16x32xf32>
    %21 = tpu.matmul %19, %20, %cst_13 {dimension_numbers = #tpu.dot_dimension_numbers<[1], [0], [0], [1], [0, 0, 1, 1], [], []>} : vector<16x64xbf16>, vector<64x32xbf16>, vector<16x32xf32> -> vector<16x32xf32>
    %22 = arith.addf %18, %21 : vector<16x32xf32>
    %c0_14 = arith.constant 0 : index
    %c0_15 = arith.constant 0 : index
    %23 = vector.load %arg10[%c0_14, %c0_15] : memref<16x32xf32, #tpu.memory_space<vmem>>, vector<16x32xf32>
    tpu.vector_store %arg10[%c0_14, %c0_15], %22 {strides = array<i32>} : memref<16x32xf32, #tpu.memory_space<vmem>>, vector<16x32xf32>,
    %c0_i32_16 = arith.constant 0 : i32
    %24 = arith.cmpi eq, %arg1, %c0_i32_16 : i32
    %25 = arith.extui %24 : i1 to i32
    %c0_i32_17 = arith.constant 0 : i32
    %26 = arith.cmpi ne, %25, %c0_i32_17 : i32
    scf.if %26 {
      %c0_18 = arith.constant 0 : index
      %c0_19 = arith.constant 0 : index
      %27 = vector.load %arg2[%c0_18, %c0_19] : memref<16x32xf32, #tpu.memory_space<vmem>>, vector<16x32xf32>
      %c0_20 = arith.constant 0 : index
      %c0_21 = arith.constant 0 : index
      %28 = vector.load %arg10[%c0_20, %c0_21] : memref<16x32xf32, #tpu.memory_space<vmem>>, vector<16x32xf32>
      %29 = arith.addf %27, %28 : vector<16x32xf32>
      %c0_22 = arith.constant 0 : index
      %c0_23 = arith.constant 0 : index
      %30 = vector.load %arg6[%c0_22, %c0_23] : memref<1x32xf32, #tpu.memory_space<vmem>>, vector<1x32xf32>
      %31 = vector.broadcast %30 : vector<1x32xf32> to vector<16x32xf32>
      %32 = arith.addf %29, %31 : vector<16x32xf32>
      %c0_24 = arith.constant 0 : index
      %c0_25 = arith.constant 0 : index
      %33 = vector.load %arg7[%c0_24, %c0_25] : memref<1x32xf32, #tpu.memory_space<vmem>>, vector<1x32xf32>
      %c0_26 = arith.constant 0 : index
      %c0_27 = arith.constant 0 : index
      %34 = vector.load %arg8[%c0_26, %c0_27] : memref<1x32xf32, #tpu.memory_space<vmem>>, vector<1x32xf32>
      %cst_28 = arith.constant dense<0.000000e+00> : vector<16xf32>
      %35 = vector.multi_reduction <add>, %32, %cst_28 [1] : vector<16x32xf32> to vector<16xf32>
      %36 = vector.shape_cast %35 : vector<16xf32> to vector<16x1xf32>
      %cst_29 = arith.constant 3.200000e+01 : f32
      %37 = vector.broadcast %cst_29 : f32 to vector<16x1xf32>
      %38 = arith.divf %36, %37 : vector<16x1xf32>
      %39 = arith.mulf %32, %32 : vector<16x32xf32>
      %cst_30 = arith.constant dense<0.000000e+00> : vector<16xf32>
      %40 = vector.multi_reduction <add>, %39, %cst_30 [1] : vector<16x32xf32> to vector<16xf32>
      %41 = vector.shape_cast %40 : vector<16xf32> to vector<16x1xf32>
      %cst_31 = arith.constant 3.200000e+01 : f32
      %42 = vector.broadcast %cst_31 : f32 to vector<16x1xf32>
      %43 = arith.divf %41, %42 : vector<16x1xf32>
      %44 = arith.mulf %38, %38 : vector<16x1xf32>
      %45 = arith.subf %43, %44 : vector<16x1xf32>
      %46 = vector.broadcast %38 : vector<16x1xf32> to vector<16x32xf32>
      %47 = arith.subf %32, %46 : vector<16x32xf32>
      %cst_32 = arith.constant 9.99999974E-6 : f32
      %48 = vector.broadcast %cst_32 : f32 to vector<16x1xf32>
      %49 = arith.addf %45, %48 : vector<16x1xf32>
      %50 = math.rsqrt %49 : vector<16x1xf32>
      %51 = vector.broadcast %50 : vector<16x1xf32> to vector<16x32xf32>
      %52 = arith.mulf %47, %51 : vector<16x32xf32>
      %53 = vector.broadcast %33 : vector<1x32xf32> to vector<16x32xf32>
      %54 = arith.mulf %52, %53 : vector<16x32xf32>
      %55 = vector.broadcast %34 : vector<1x32xf32> to vector<16x32xf32>
      %56 = arith.addf %54, %55 : vector<16x32xf32>
      %c0_33 = arith.constant 0 : index
      %c0_34 = arith.constant 0 : index
      %57 = vector.load %arg9[%c0_33, %c0_34] : memref<16x32xf32, #tpu.memory_space<vmem>>, vector<16x32xf32>
      tpu.vector_store %arg9[%c0_33, %c0_34], %56 {strides = array<i32>} : memref<16x32xf32, #tpu.memory_space<vmem>>, vector<16x32xf32>,
    } else {
    }
    return
  }
  func.func @transform_0(%arg0: i32, %arg1: i32) -> (i32, i32) {
    %c0_i32 = arith.constant 0 : i32
    %c0_i32_0 = arith.constant 0 : i32
    return %arg0, %c0_i32 : i32, i32
  }
  func.func @transform_1(%arg0: i32, %arg1: i32) -> (i32, i32) {
    %c0_i32 = arith.constant 0 : i32
    %c0_i32_0 = arith.constant 0 : i32
    return %c0_i32, %arg1 : i32, i32
  }
  func.func @transform_2(%arg0: i32, %arg1: i32) -> (i32, i32) {
    %c0_i32 = arith.constant 0 : i32
    %c0_i32_0 = arith.constant 0 : i32
    return %c0_i32, %arg1 : i32, i32
  }
  func.func @transform_3(%arg0: i32, %arg1: i32) -> (i32, i32) {
    %c0_i32 = arith.constant 0 : i32
    %c0_i32_0 = arith.constant 0 : i32
    return %arg1, %c0_i32 : i32, i32
  }
  func.func @transform_4(%arg0: i32, %arg1: i32) -> (i32, i32) {
    %c0_i32 = arith.constant 0 : i32
    %c0_i32_0 = arith.constant 0 : i32
    %c0_i32_1 = arith.constant 0 : i32
    return %c0_i32, %c0_i32_0 : i32, i32
  }
  func.func @transform_5(%arg0: i32, %arg1: i32) -> (i32, i32) {
    %c0_i32 = arith.constant 0 : i32
    %c0_i32_0 = arith.constant 0 : i32
    %c0_i32_1 = arith.constant 0 : i32
    return %c0_i32, %c0_i32_0 : i32, i32
  }
  func.func @transform_6(%arg0: i32, %arg1: i32) -> (i32, i32) {
    %c0_i32 = arith.constant 0 : i32
    %c0_i32_0 = arith.constant 0 : i32
    %c0_i32_1 = arith.constant 0 : i32
    return %c0_i32, %c0_i32_0 : i32, i32
  }
  func.func @transform_7(%arg0: i32, %arg1: i32) -> (i32, i32) {
    %c0_i32 = arith.constant 0 : i32
    %c0_i32_0 = arith.constant 0 : i32
    return %arg0, %c0_i32 : i32, i32
  }
}

module attributes {stable_mosaic.version = 11 : i64} {
  func.func @_cross_attn_sublayer_kernel(%arg0: i32, %arg1: memref<1x8x32xf32, #tpu.memory_space<vmem>>, %arg2: memref<1x8x32xf32, #tpu.memory_space<vmem>>, %arg3: memref<32x64xbf16, #tpu.memory_space<vmem>>, %arg4: memref<1x64xf32, #tpu.memory_space<vmem>>, %arg5: memref<32x32xbf16, #tpu.memory_space<vmem>>, %arg6: memref<1x32xf32, #tpu.memory_space<vmem>>, %arg7: memref<32x32xbf16, #tpu.memory_space<vmem>>, %arg8: memref<1x32xf32, #tpu.memory_space<vmem>>, %arg9: memref<1x32xf32, #tpu.memory_space<vmem>>, %arg10: memref<1x32xf32, #tpu.memory_space<vmem>>, %arg11: memref<1x8x32xf32, #tpu.memory_space<vmem>>, %arg12: memref<8x32xf32, #tpu.memory_space<vmem>>) attributes {dimension_semantics = [#tpu.dimension_semantics<parallel>], iteration_bounds = array<i64: 2>, scalar_prefetch = 0 : i64, scratch_operands = 1 : i64, tpu.core_type = #tpu.core_type<tc>, window_params = [{transform_indices = @transform_0, window_bounds = array<i64: 1, 8, 32>}, {transform_indices = @transform_1, window_bounds = array<i64: 1, 8, 32>}, {pipeline_mode = #tpu.pipeline_mode<synchronous>, transform_indices = @transform_2, window_bounds = array<i64: 32, 64>}, {pipeline_mode = #tpu.pipeline_mode<synchronous>, transform_indices = @transform_3, window_bounds = array<i64: 1, 64>}, {pipeline_mode = #tpu.pipeline_mode<synchronous>, transform_indices = @transform_4, window_bounds = array<i64: 32, 32>}, {pipeline_mode = #tpu.pipeline_mode<synchronous>, transform_indices = @transform_5, window_bounds = array<i64: 1, 32>}, {pipeline_mode = #tpu.pipeline_mode<synchronous>, transform_indices = @transform_6, window_bounds = array<i64: 32, 32>}, {pipeline_mode = #tpu.pipeline_mode<synchronous>, transform_indices = @transform_7, window_bounds = array<i64: 1, 32>}, {pipeline_mode = #tpu.pipeline_mode<synchronous>, transform_indices = @transform_8, window_bounds = array<i64: 1, 32>}, {pipeline_mode = #tpu.pipeline_mode<synchronous>, transform_indices = @transform_9, window_bounds = array<i64: 1, 32>}, {transform_indices = @transform_10, window_bounds = array<i64: 1, 8, 32>}]} {
    %c0 = arith.constant 0 : index
    %c0_0 = arith.constant 0 : index
    %c0_1 = arith.constant 0 : index
    %0 = vector.load %arg1[%c0, %c0_0, %c0_1] : memref<1x8x32xf32, #tpu.memory_space<vmem>>, vector<1x8x32xf32>
    %1 = vector.shape_cast %0 : vector<1x8x32xf32> to vector<8x32xf32>
    %2 = arith.truncf %1 : vector<8x32xf32> to vector<8x32xbf16>
    %c0_2 = arith.constant 0 : index
    %c0_3 = arith.constant 0 : index
    %3 = vector.load %arg3[%c0_2, %c0_3] : memref<32x64xbf16, #tpu.memory_space<vmem>>, vector<32x64xbf16>
    %cst = arith.constant dense<0.000000e+00> : vector<8x64xf32>
    %4 = tpu.matmul %2, %3, %cst {dimension_numbers = #tpu.dot_dimension_numbers<[1], [0], [0], [1], [0, 0, 1, 1], [], []>} : vector<8x32xbf16>, vector<32x64xbf16>, vector<8x64xf32> -> vector<8x64xf32>
    %c0_4 = arith.constant 0 : index
    %c0_5 = arith.constant 0 : index
    %5 = vector.load %arg4[%c0_4, %c0_5] : memref<1x64xf32, #tpu.memory_space<vmem>>, vector<1x64xf32>
    %6 = vector.broadcast %5 : vector<1x64xf32> to vector<8x64xf32>
    %7 = arith.addf %4, %6 : vector<8x64xf32>
    %c0_6 = arith.constant 0 : index
    %c0_7 = arith.constant 0 : index
    %c0_8 = arith.constant 0 : index
    %8 = vector.load %arg2[%c0_6, %c0_7, %c0_8] : memref<1x8x32xf32, #tpu.memory_space<vmem>>, vector<1x8x32xf32>
    %9 = vector.shape_cast %8 : vector<1x8x32xf32> to vector<8x32xf32>
    %10 = arith.truncf %9 : vector<8x32xf32> to vector<8x32xbf16>
    %c0_9 = arith.constant 0 : index
    %c0_10 = arith.constant 0 : index
    %11 = vector.load %arg5[%c0_9, %c0_10] : memref<32x32xbf16, #tpu.memory_space<vmem>>, vector<32x32xbf16>
    %cst_11 = arith.constant dense<0.000000e+00> : vector<8x32xf32>
    %12 = tpu.matmul %10, %11, %cst_11 {dimension_numbers = #tpu.dot_dimension_numbers<[1], [0], [0], [1], [0, 0, 1, 1], [], []>} : vector<8x32xbf16>, vector<32x32xbf16>, vector<8x32xf32> -> vector<8x32xf32>
    %c0_12 = arith.constant 0 : index
    %c0_13 = arith.constant 0 : index
    %13 = vector.load %arg6[%c0_12, %c0_13] : memref<1x32xf32, #tpu.memory_space<vmem>>, vector<1x32xf32>
    %14 = vector.broadcast %13 : vector<1x32xf32> to vector<8x32xf32>
    %15 = arith.addf %12, %14 : vector<8x32xf32>
    %16 = vector.extract_strided_slice %7 {offsets = [0, 0], sizes = [8, 8], strides = [1, 1]} : vector<8x64xf32> to vector<8x8xf32>
    %17 = vector.extract_strided_slice %7 {offsets = [0, 32], sizes = [8, 8], strides = [1, 1]} : vector<8x64xf32> to vector<8x8xf32>
    %18 = vector.extract_strided_slice %15 {offsets = [0, 0], sizes = [8, 8], strides = [1, 1]} : vector<8x32xf32> to vector<8x8xf32>
    %19 = arith.truncf %16 : vector<8x8xf32> to vector<8x8xbf16>
    %20 = arith.truncf %17 : vector<8x8xf32> to vector<8x8xbf16>
    %cst_14 = arith.constant dense<0.000000e+00> : vector<8x8xf32>
    %21 = tpu.matmul %19, %20, %cst_14 {dimension_numbers = #tpu.dot_dimension_numbers<[1], [1], [0], [0], [0, 0, 1, 0], [], []>} : vector<8x8xbf16>, vector<8x8xbf16>, vector<8x8xf32> -> vector<8x8xf32>
    %cst_15 = arith.constant dense<0xFF800000> : vector<8xf32>
    %22 = vector.multi_reduction <maximumf>, %21, %cst_15 [1] : vector<8x8xf32> to vector<8xf32>
    %23 = vector.shape_cast %22 : vector<8xf32> to vector<8x1xf32>
    %24 = vector.broadcast %23 : vector<8x1xf32> to vector<8x8xf32>
    %25 = arith.subf %21, %24 : vector<8x8xf32>
    %26 = math.exp %25 : vector<8x8xf32>
    %cst_16 = arith.constant dense<0.000000e+00> : vector<8xf32>
    %27 = vector.multi_reduction <add>, %26, %cst_16 [1] : vector<8x8xf32> to vector<8xf32>
    %28 = vector.shape_cast %27 : vector<8xf32> to vector<8x1xf32>
    %29 = vector.broadcast %28 : vector<8x1xf32> to vector<8x8xf32>
    %30 = arith.divf %26, %29 : vector<8x8xf32>
    %31 = arith.truncf %30 : vector<8x8xf32> to vector<8x8xbf16>
    %32 = arith.truncf %18 : vector<8x8xf32> to vector<8x8xbf16>
    %cst_17 = arith.constant dense<0.000000e+00> : vector<8x8xf32>
    %33 = tpu.matmul %31, %32, %cst_17 {dimension_numbers = #tpu.dot_dimension_numbers<[1], [0], [0], [1], [0, 0, 1, 1], [], []>} : vector<8x8xbf16>, vector<8x8xbf16>, vector<8x8xf32> -> vector<8x8xf32>
    %c0_18 = arith.constant 0 : index
    %c0_19 = arith.constant 0 : index
    %34 = vector.load %arg12[%c0_18, %c0_19] : memref<8x32xf32, #tpu.memory_space<vmem>>, vector<8x8xf32>
    tpu.vector_store %arg12[%c0_18, %c0_19], %33 {strides = array<i32>} : memref<8x32xf32, #tpu.memory_space<vmem>>, vector<8x8xf32>,
    %35 = vector.extract_strided_slice %7 {offsets = [0, 8], sizes = [8, 8], strides = [1, 1]} : vector<8x64xf32> to vector<8x8xf32>
    %36 = vector.extract_strided_slice %7 {offsets = [0, 40], sizes = [8, 8], strides = [1, 1]} : vector<8x64xf32> to vector<8x8xf32>
    %37 = vector.extract_strided_slice %15 {offsets = [0, 8], sizes = [8, 8], strides = [1, 1]} : vector<8x32xf32> to vector<8x8xf32>
    %38 = arith.truncf %35 : vector<8x8xf32> to vector<8x8xbf16>
    %39 = arith.truncf %36 : vector<8x8xf32> to vector<8x8xbf16>
    %cst_20 = arith.constant dense<0.000000e+00> : vector<8x8xf32>
    %40 = tpu.matmul %38, %39, %cst_20 {dimension_numbers = #tpu.dot_dimension_numbers<[1], [1], [0], [0], [0, 0, 1, 0], [], []>} : vector<8x8xbf16>, vector<8x8xbf16>, vector<8x8xf32> -> vector<8x8xf32>
    %cst_21 = arith.constant dense<0xFF800000> : vector<8xf32>
    %41 = vector.multi_reduction <maximumf>, %40, %cst_21 [1] : vector<8x8xf32> to vector<8xf32>
    %42 = vector.shape_cast %41 : vector<8xf32> to vector<8x1xf32>
    %43 = vector.broadcast %42 : vector<8x1xf32> to vector<8x8xf32>
    %44 = arith.subf %40, %43 : vector<8x8xf32>
    %45 = math.exp %44 : vector<8x8xf32>
    %cst_22 = arith.constant dense<0.000000e+00> : vector<8xf32>
    %46 = vector.multi_reduction <add>, %45, %cst_22 [1] : vector<8x8xf32> to vector<8xf32>
    %47 = vector.shape_cast %46 : vector<8xf32> to vector<8x1xf32>
    %48 = vector.broadcast %47 : vector<8x1xf32> to vector<8x8xf32>
    %49 = arith.divf %45, %48 : vector<8x8xf32>
    %50 = arith.truncf %49 : vector<8x8xf32> to vector<8x8xbf16>
    %51 = arith.truncf %37 : vector<8x8xf32> to vector<8x8xbf16>
    %cst_23 = arith.constant dense<0.000000e+00> : vector<8x8xf32>
    %52 = tpu.matmul %50, %51, %cst_23 {dimension_numbers = #tpu.dot_dimension_numbers<[1], [0], [0], [1], [0, 0, 1, 1], [], []>} : vector<8x8xbf16>, vector<8x8xbf16>, vector<8x8xf32> -> vector<8x8xf32>
    %c0_24 = arith.constant 0 : index
    %c8 = arith.constant 8 : index
    %53 = vector.load %arg12[%c0_24, %c8] : memref<8x32xf32, #tpu.memory_space<vmem>>, vector<8x8xf32>
    tpu.vector_store %arg12[%c0_24, %c8], %52 {strides = array<i32>} : memref<8x32xf32, #tpu.memory_space<vmem>>, vector<8x8xf32>,
    %54 = vector.extract_strided_slice %7 {offsets = [0, 16], sizes = [8, 8], strides = [1, 1]} : vector<8x64xf32> to vector<8x8xf32>
    %55 = vector.extract_strided_slice %7 {offsets = [0, 48], sizes = [8, 8], strides = [1, 1]} : vector<8x64xf32> to vector<8x8xf32>
    %56 = vector.extract_strided_slice %15 {offsets = [0, 16], sizes = [8, 8], strides = [1, 1]} : vector<8x32xf32> to vector<8x8xf32>
    %57 = arith.truncf %54 : vector<8x8xf32> to vector<8x8xbf16>
    %58 = arith.truncf %55 : vector<8x8xf32> to vector<8x8xbf16>
    %cst_25 = arith.constant dense<0.000000e+00> : vector<8x8xf32>
    %59 = tpu.matmul %57, %58, %cst_25 {dimension_numbers = #tpu.dot_dimension_numbers<[1], [1], [0], [0], [0, 0, 1, 0], [], []>} : vector<8x8xbf16>, vector<8x8xbf16>, vector<8x8xf32> -> vector<8x8xf32>
    %cst_26 = arith.constant dense<0xFF800000> : vector<8xf32>
    %60 = vector.multi_reduction <maximumf>, %59, %cst_26 [1] : vector<8x8xf32> to vector<8xf32>
    %61 = vector.shape_cast %60 : vector<8xf32> to vector<8x1xf32>
    %62 = vector.broadcast %61 : vector<8x1xf32> to vector<8x8xf32>
    %63 = arith.subf %59, %62 : vector<8x8xf32>
    %64 = math.exp %63 : vector<8x8xf32>
    %cst_27 = arith.constant dense<0.000000e+00> : vector<8xf32>
    %65 = vector.multi_reduction <add>, %64, %cst_27 [1] : vector<8x8xf32> to vector<8xf32>
    %66 = vector.shape_cast %65 : vector<8xf32> to vector<8x1xf32>
    %67 = vector.broadcast %66 : vector<8x1xf32> to vector<8x8xf32>
    %68 = arith.divf %64, %67 : vector<8x8xf32>
    %69 = arith.truncf %68 : vector<8x8xf32> to vector<8x8xbf16>
    %70 = arith.truncf %56 : vector<8x8xf32> to vector<8x8xbf16>
    %cst_28 = arith.constant dense<0.000000e+00> : vector<8x8xf32>
    %71 = tpu.matmul %69, %70, %cst_28 {dimension_numbers = #tpu.dot_dimension_numbers<[1], [0], [0], [1], [0, 0, 1, 1], [], []>} : vector<8x8xbf16>, vector<8x8xbf16>, vector<8x8xf32> -> vector<8x8xf32>
    %c0_29 = arith.constant 0 : index
    %c16 = arith.constant 16 : index
    %72 = vector.load %arg12[%c0_29, %c16] : memref<8x32xf32, #tpu.memory_space<vmem>>, vector<8x8xf32>
    tpu.vector_store %arg12[%c0_29, %c16], %71 {strides = array<i32>} : memref<8x32xf32, #tpu.memory_space<vmem>>, vector<8x8xf32>,
    %73 = vector.extract_strided_slice %7 {offsets = [0, 24], sizes = [8, 8], strides = [1, 1]} : vector<8x64xf32> to vector<8x8xf32>
    %74 = vector.extract_strided_slice %7 {offsets = [0, 56], sizes = [8, 8], strides = [1, 1]} : vector<8x64xf32> to vector<8x8xf32>
    %75 = vector.extract_strided_slice %15 {offsets = [0, 24], sizes = [8, 8], strides = [1, 1]} : vector<8x32xf32> to vector<8x8xf32>
    %76 = arith.truncf %73 : vector<8x8xf32> to vector<8x8xbf16>
    %77 = arith.truncf %74 : vector<8x8xf32> to vector<8x8xbf16>
    %cst_30 = arith.constant dense<0.000000e+00> : vector<8x8xf32>
    %78 = tpu.matmul %76, %77, %cst_30 {dimension_numbers = #tpu.dot_dimension_numbers<[1], [1], [0], [0], [0, 0, 1, 0], [], []>} : vector<8x8xbf16>, vector<8x8xbf16>, vector<8x8xf32> -> vector<8x8xf32>
    %cst_31 = arith.constant dense<0xFF800000> : vector<8xf32>
    %79 = vector.multi_reduction <maximumf>, %78, %cst_31 [1] : vector<8x8xf32> to vector<8xf32>
    %80 = vector.shape_cast %79 : vector<8xf32> to vector<8x1xf32>
    %81 = vector.broadcast %80 : vector<8x1xf32> to vector<8x8xf32>
    %82 = arith.subf %78, %81 : vector<8x8xf32>
    %83 = math.exp %82 : vector<8x8xf32>
    %cst_32 = arith.constant dense<0.000000e+00> : vector<8xf32>
    %84 = vector.multi_reduction <add>, %83, %cst_32 [1] : vector<8x8xf32> to vector<8xf32>
    %85 = vector.shape_cast %84 : vector<8xf32> to vector<8x1xf32>
    %86 = vector.broadcast %85 : vector<8x1xf32> to vector<8x8xf32>
    %87 = arith.divf %83, %86 : vector<8x8xf32>
    %88 = arith.truncf %87 : vector<8x8xf32> to vector<8x8xbf16>
    %89 = arith.truncf %75 : vector<8x8xf32> to vector<8x8xbf16>
    %cst_33 = arith.constant dense<0.000000e+00> : vector<8x8xf32>
    %90 = tpu.matmul %88, %89, %cst_33 {dimension_numbers = #tpu.dot_dimension_numbers<[1], [0], [0], [1], [0, 0, 1, 1], [], []>} : vector<8x8xbf16>, vector<8x8xbf16>, vector<8x8xf32> -> vector<8x8xf32>
    %c0_34 = arith.constant 0 : index
    %c24 = arith.constant 24 : index
    %91 = vector.load %arg12[%c0_34, %c24] : memref<8x32xf32, #tpu.memory_space<vmem>>, vector<8x8xf32>
    tpu.vector_store %arg12[%c0_34, %c24], %90 {strides = array<i32>} : memref<8x32xf32, #tpu.memory_space<vmem>>, vector<8x8xf32>,
    %c0_35 = arith.constant 0 : index
    %c0_36 = arith.constant 0 : index
    %92 = vector.load %arg12[%c0_35, %c0_36] : memref<8x32xf32, #tpu.memory_space<vmem>>, vector<8x32xf32>
    %93 = arith.truncf %92 : vector<8x32xf32> to vector<8x32xbf16>
    %c0_37 = arith.constant 0 : index
    %c0_38 = arith.constant 0 : index
    %94 = vector.load %arg7[%c0_37, %c0_38] : memref<32x32xbf16, #tpu.memory_space<vmem>>, vector<32x32xbf16>
    %cst_39 = arith.constant dense<0.000000e+00> : vector<8x32xf32>
    %95 = tpu.matmul %93, %94, %cst_39 {dimension_numbers = #tpu.dot_dimension_numbers<[1], [0], [0], [1], [0, 0, 1, 1], [], []>} : vector<8x32xbf16>, vector<32x32xbf16>, vector<8x32xf32> -> vector<8x32xf32>
    %c0_40 = arith.constant 0 : index
    %c0_41 = arith.constant 0 : index
    %96 = vector.load %arg8[%c0_40, %c0_41] : memref<1x32xf32, #tpu.memory_space<vmem>>, vector<1x32xf32>
    %97 = vector.broadcast %96 : vector<1x32xf32> to vector<8x32xf32>
    %98 = arith.addf %95, %97 : vector<8x32xf32>
    %99 = arith.addf %1, %98 : vector<8x32xf32>
    %c0_42 = arith.constant 0 : index
    %c0_43 = arith.constant 0 : index
    %100 = vector.load %arg9[%c0_42, %c0_43] : memref<1x32xf32, #tpu.memory_space<vmem>>, vector<1x32xf32>
    %c0_44 = arith.constant 0 : index
    %c0_45 = arith.constant 0 : index
    %101 = vector.load %arg10[%c0_44, %c0_45] : memref<1x32xf32, #tpu.memory_space<vmem>>, vector<1x32xf32>
    %cst_46 = arith.constant dense<0.000000e+00> : vector<8xf32>
    %102 = vector.multi_reduction <add>, %99, %cst_46 [1] : vector<8x32xf32> to vector<8xf32>
    %103 = vector.shape_cast %102 : vector<8xf32> to vector<8x1xf32>
    %cst_47 = arith.constant 3.200000e+01 : f32
    %104 = vector.broadcast %cst_47 : f32 to vector<8x1xf32>
    %105 = arith.divf %103, %104 : vector<8x1xf32>
    %106 = arith.mulf %99, %99 : vector<8x32xf32>
    %cst_48 = arith.constant dense<0.000000e+00> : vector<8xf32>
    %107 = vector.multi_reduction <add>, %106, %cst_48 [1] : vector<8x32xf32> to vector<8xf32>
    %108 = vector.shape_cast %107 : vector<8xf32> to vector<8x1xf32>
    %cst_49 = arith.constant 3.200000e+01 : f32
    %109 = vector.broadcast %cst_49 : f32 to vector<8x1xf32>
    %110 = arith.divf %108, %109 : vector<8x1xf32>
    %111 = arith.mulf %105, %105 : vector<8x1xf32>
    %112 = arith.subf %110, %111 : vector<8x1xf32>
    %113 = vector.broadcast %105 : vector<8x1xf32> to vector<8x32xf32>
    %114 = arith.subf %99, %113 : vector<8x32xf32>
    %cst_50 = arith.constant 9.99999974E-6 : f32
    %115 = vector.broadcast %cst_50 : f32 to vector<8x1xf32>
    %116 = arith.addf %112, %115 : vector<8x1xf32>
    %117 = math.rsqrt %116 : vector<8x1xf32>
    %118 = vector.broadcast %117 : vector<8x1xf32> to vector<8x32xf32>
    %119 = arith.mulf %114, %118 : vector<8x32xf32>
    %120 = vector.broadcast %100 : vector<1x32xf32> to vector<8x32xf32>
    %121 = arith.mulf %119, %120 : vector<8x32xf32>
    %122 = vector.broadcast %101 : vector<1x32xf32> to vector<8x32xf32>
    %123 = arith.addf %121, %122 : vector<8x32xf32>
    %c0_51 = arith.constant 0 : index
    %c0_52 = arith.constant 0 : index
    %c0_53 = arith.constant 0 : index
    %124 = vector.load %arg11[%c0_51, %c0_52, %c0_53] : memref<1x8x32xf32, #tpu.memory_space<vmem>>, vector<1x8x32xf32>
    %125 = vector.shape_cast %124 : vector<1x8x32xf32> to vector<8x32xf32>
    %126 = vector.shape_cast %123 : vector<8x32xf32> to vector<1x8x32xf32>
    tpu.vector_store %arg11[%c0_51, %c0_52, %c0_53], %126 {strides = array<i32>} : memref<1x8x32xf32, #tpu.memory_space<vmem>>, vector<1x8x32xf32>,
    return
  }
  func.func @transform_0(%arg0: i32) -> (i32, i32, i32) {
    %c0_i32 = arith.constant 0 : i32
    %c0_i32_0 = arith.constant 0 : i32
    %c0_i32_1 = arith.constant 0 : i32
    return %arg0, %c0_i32, %c0_i32_0 : i32, i32, i32
  }
  func.func @transform_1(%arg0: i32) -> (i32, i32, i32) {
    %c0_i32 = arith.constant 0 : i32
    %c0_i32_0 = arith.constant 0 : i32
    %c0_i32_1 = arith.constant 0 : i32
    return %arg0, %c0_i32, %c0_i32_0 : i32, i32, i32
  }
  func.func @transform_2(%arg0: i32) -> (i32, i32) {
    %c0_i32 = arith.constant 0 : i32
    %c0_i32_0 = arith.constant 0 : i32
    %c0_i32_1 = arith.constant 0 : i32
    return %c0_i32, %c0_i32_0 : i32, i32
  }
  func.func @transform_3(%arg0: i32) -> (i32, i32) {
    %c0_i32 = arith.constant 0 : i32
    %c0_i32_0 = arith.constant 0 : i32
    %c0_i32_1 = arith.constant 0 : i32
    return %c0_i32, %c0_i32_0 : i32, i32
  }
  func.func @transform_4(%arg0: i32) -> (i32, i32) {
    %c0_i32 = arith.constant 0 : i32
    %c0_i32_0 = arith.constant 0 : i32
    %c0_i32_1 = arith.constant 0 : i32
    return %c0_i32, %c0_i32_0 : i32, i32
  }
  func.func @transform_5(%arg0: i32) -> (i32, i32) {
    %c0_i32 = arith.constant 0 : i32
    %c0_i32_0 = arith.constant 0 : i32
    %c0_i32_1 = arith.constant 0 : i32
    return %c0_i32, %c0_i32_0 : i32, i32
  }
  func.func @transform_6(%arg0: i32) -> (i32, i32) {
    %c0_i32 = arith.constant 0 : i32
    %c0_i32_0 = arith.constant 0 : i32
    %c0_i32_1 = arith.constant 0 : i32
    return %c0_i32, %c0_i32_0 : i32, i32
  }
  func.func @transform_7(%arg0: i32) -> (i32, i32) {
    %c0_i32 = arith.constant 0 : i32
    %c0_i32_0 = arith.constant 0 : i32
    %c0_i32_1 = arith.constant 0 : i32
    return %c0_i32, %c0_i32_0 : i32, i32
  }
  func.func @transform_8(%arg0: i32) -> (i32, i32) {
    %c0_i32 = arith.constant 0 : i32
    %c0_i32_0 = arith.constant 0 : i32
    %c0_i32_1 = arith.constant 0 : i32
    return %c0_i32, %c0_i32_0 : i32, i32
  }
  func.func @transform_9(%arg0: i32) -> (i32, i32) {
    %c0_i32 = arith.constant 0 : i32
    %c0_i32_0 = arith.constant 0 : i32
    %c0_i32_1 = arith.constant 0 : i32
    return %c0_i32, %c0_i32_0 : i32, i32
  }
  func.func @transform_10(%arg0: i32) -> (i32, i32, i32) {
    %c0_i32 = arith.constant 0 : i32
    %c0_i32_0 = arith.constant 0 : i32
    %c0_i32_1 = arith.constant 0 : i32
    return %arg0, %c0_i32, %c0_i32_0 : i32, i32, i32
  }
}

</mosaic_0001>

<bundles_post_ra>
// kernel: _lambda_.5
= control target key start
LH: loop header
LB: loop body
LE: loop exit
PB: predicated region body
PF: predicated region fallthrough
CT: control target
= control target key end

     0   :  { %12 = vsyncpa [#allocation4], 0  ;;  %s404_s27 = smov [#allocation3]   ;;  %s405_s29 = smov 64   ;;  %s525_s0 = inlined_call_operand.vmem [shape: f32[16,32], index: 0, kind: input, shape index: {}]   ;;  %s526_s1 = inlined_call_operand.hbm [shape: bf16[32,64], index: 1, kind: input, shape index: {}]   ;;  %s527_s2 = inlined_call_operand.vmem [shape: f32[1,64], index: 2, kind: input, shape index: {}]   ;;  %s528_s3 = inlined_call_operand.vmem [shape: bf16[64,32], index: 3, kind: input, shape index: {}]   ;;  %s529_s4 = inlined_call_operand.vmem [shape: f32[1,32], index: 4, kind: input, shape index: {}]   ;;  %s530_s5 = inlined_call_operand.vmem [shape: f32[1,32], index: 5, kind: input, shape index: {}]   ;;  %s531_s6 = inlined_call_operand.vmem [shape: f32[1,32], index: 6, kind: input, shape index: {}]   ;;  %s532_s7 = inlined_call_operand.vmem [shape: f32[16,32], index: 7, kind: output, shape index: {}]  }
   0x1   :  { %s19_s26 = sshll.u32 %s526_s1, 4  ;;  %s21_s28 = sshll.u32 %s404_s27, 4  ;;  %s20_s26 = int_to_ptr.hbm [resolvable:$true] %s19_s26  ;;  %s22_s28 = int_to_ptr.vmem [resolvable:$true] %s21_s28 }
   0x2   :  { %s406_s30 = smov 4  }
   0x3   :  { %27 = dma.hbm_to_vmem [thread:$0]  %s20_s26, 256, %s22_s28, [#allocation4], %s405_s29, %s405_s29, %s406_s30  }
   0x4   :  { %402 = dma.done.wait [#allocation4], 256  }
   0x5   :  { %403 = vsyncadd [#allocation4], 4294967040  ;;  %v354_v0 = vld [vmem:[#allocation3 + $0x8] sm:$0xff]  ;;  %v353_v1 = vld [vmem:[#allocation3] sm:$0xff]  ;;  %vm47_vm0 = vcmask 261120   ;;  %v407_v52 = vmov 0.0  }
   0x6   :  { %v455_v2 = vld [vmem:[%s525_s0] sm:$0xff]  ;;  %v460_v3 = vld [vmem:[%s525_s0 + $0x8] sm:$0xff]  ;;  %83 = vmatpush.bf16.msra.mxu0 %v354_v0  ;;  %v358_v24 = vld [vmem:[%s528_s3 + $0x18] sm:$0xff]  ;;  %48 = vst.msk [vmem:[#allocation2] sm:$0xff] %vm47_vm0, %v407_v52  ;;  %vm214_vm9 = vcmask 523264  }
   0x7   :  { %v52_v4 = vpack.c.bf16 %v460_v3, %v455_v2  ;;  %v364_v5 = vld [vmem:[%s527_s2] ss:$0 sm:$0xff]  ;;  %222 = vmatpush.bf16.msra.mxu1 %v358_v24  ;;  %v357_v32 = vld [vmem:[%s528_s3 + $0x10] sm:$0xff]  ;;  %v356_v40 = vld [vmem:[%s528_s3 + $0x8] sm:$0xff]  ;;  %49 = vst.msk [vmem:[#allocation2 + $0x8] sm:$0xff] %vm47_vm0, %v407_v52 }
   0x8   :  { %v355_v46 = vld [vmem:[%s528_s3] sm:$0xff] }
   0xa   :  { %84 = vmatpush.bf16.msra.mxu0 %v353_v1 }
   0xb   :  { %223 = vmatpush.bf16.msra.mxu1 %v357_v32 }
   0xd   :  { %333 = vmatmul.msk.bf16.vlgmr.msra.gmra.mxu0 %vm47_vm0, %v52_v4 }
   0xf   :  { %224 = vmatpush.bf16.msra.mxu1 %v356_v40 }
  0x13   :  { %225 = vmatpush.bf16.msra.mxu1 %v355_v46 }
  0x8a   :  { %v86_v6 = vpop.f32.mrf.mxu0 }
  0x8b   :  { %v468_v7 = vadd.f32 %v364_v5, %v86_v6 }
  0x8d   :  { %v471_v8 = vmul.f32 0.70710677, %v468_v7 }
  0x8f   :  { %v95_v9 = vmul.f32 %v471_v8, %v471_v8 }
  0x91   :  { %v96_v10 = vmin.f32 %v95_v9, 16.0 }
  0x92   :  { %v88_v11 = vpop.f32.mrf.mxu0 }
  0x93   :  { %v97_v12 = vmul.f32 2.1237322e-06, %v96_v10  ;;  %v108_v13 = vmul.f32 3.8918573e-05, %v96_v10  ;;  %v475_v14 = vadd.f32 %v364_v5, %v88_v11 }
  0x95   :  { %v98_v15 = vadd.f32 0.00028619796, %v97_v12  ;;  %v109_v16 = vadd.f32 0.001143296, %v108_v13  ;;  %v478_v17 = vmul.f32 0.70710677, %v475_v14 }
  0x97   :  { %v110_v18 = vmul.f32 %v109_v16, %v96_v10  ;;  %v135_v19 = vmul.f32 %v478_v17, %v478_v17  ;;  %v99_v20 = vmul.f32 %v98_v15, %v96_v10 }
  0x99   :  { %v111_v21 = vadd.f32 0.014752088, %v110_v18  ;;  %v136_v22 = vmin.f32 %v135_v19, 16.0  ;;  %v100_v27 = vadd.f32 0.0036580483, %v99_v20 }
  0x9b   :  { %v112_v23 = vmul.f32 %v111_v21, %v96_v10  ;;  %v137_v25 = vmul.f32 2.1237322e-06, %v136_v22  ;;  %v148_v26 = vmul.f32 3.8918573e-05, %v136_v22  ;;  %v101_v35 = vmul.f32 %v100_v27, %v96_v10 }
  0x9d   :  { %v113_v28 = vadd.f32 0.112945676, %v112_v23  ;;  %v138_v29 = vadd.f32 0.00028619796, %v137_v25  ;;  %v149_v30 = vadd.f32 0.001143296, %v148_v26 }
  0x9e   :  { %v102_v42 = vadd.f32 0.05243302, %v101_v35  ;;  %v179_v35 = vld [vmem:[#allocation2] sm:$0xff] }
  0x9f   :  { %v114_v31 = vmul.f32 %v113_v28, %v96_v10  ;;  %v139_v33 = vmul.f32 %v138_v29, %v136_v22  ;;  %v150_v34 = vmul.f32 %v149_v30, %v136_v22  ;;  %v91_v29 = vmul.f32 0.5, %v468_v7  ;;  %v365_v7 = vld [vmem:[%s529_s4] ss:$0 sm:$0xff] }
  0xa0   :  { %v103_v48 = vmul.f32 %v102_v42, %v96_v10  ;;  %v92_v30 = vmul.f32 0.5, %v475_v14 }
  0xa1   :  { %v115_v36 = vadd.f32 0.4994258, %v114_v31  ;;  %v140_v37 = vadd.f32 0.0036580483, %v139_v33  ;;  %v151_v38 = vadd.f32 0.014752088, %v150_v34 }
  0xa2   :  { %v104_v54 = vadd.f32 0.18741608, %v103_v48 }
  0xa3   :  { %v116_v39 = vmul.f32 %v115_v36, %v96_v10  ;;  %v152_v41 = vmul.f32 %v151_v38, %v136_v22  ;;  %v141_v44 = vmul.f32 %v140_v37, %v136_v22 }
  0xa4   :  { %v105_v59 = vmul.f32 %v104_v54, %v96_v10 }
  0xa5   :  { %v117_v43 = vadd.f32 1.0, %v116_v39  ;;  %v153_v45 = vadd.f32 0.112945676, %v152_v41  ;;  %v142_v49 = vadd.f32 0.05243302, %v141_v44 }
  0xa6   :  { %v106_v1 = vadd.f32 1.1283791, %v105_v59 }
  0xa7   :  { %368 = vrcp.f32 %v117_v43  ;;  %v154_v47 = vmul.f32 %v153_v45, %v136_v22  ;;  %v143_v56 = vmul.f32 %v142_v49, %v136_v22  ;;  %v129_v61 = vand.u32 2147483648, %v117_v43 }
  0xa8   :  { %v127_v63 = vand.u32 2147483647, %v117_v43  ;;  %vm123_vm2 = vweird.f32 %v117_v43  ;;  %v107_v13 = vmul.f32 %v106_v1, %v471_v8 }
  0xa9   :  { %v155_v50 = vadd.f32 0.4994258, %v154_v47  ;;  %v144_v62 = vadd.f32 0.18741608, %v143_v56  ;;  %v130_v6 = vor.u32 1.1754944e-38, %v129_v61 }
  0xaa   :  { %vm128_vm4 = vcmp.eq.f32.partialorder %v127_v63, 8.507059e+37 }
  0xab   :  { %v156_v51 = vmul.f32 %v155_v50, %v136_v22  ;;  %v145_v9 = vmul.f32 %v144_v62, %v136_v22 }
  0xad   :  { %v369_v53 = vpop.eup %368  ;;  %v157_v57 = vadd.f32 1.0, %v156_v51  ;;  %v146_v10 = vadd.f32 1.1283791, %v145_v9 }
  0xae   :  { %v119_v55 = vmul.f32 %v369_v53, %v117_v43  ;;  %vm124_vm1 = vweird.f32 %v369_v53 }
  0xaf   :  { %370 = vrcp.f32 %v157_v57  ;;  %vm125_vm3 = vmor %vm123_vm2, %vm124_vm1  ;;  %v169_v16 = vand.u32 2147483648, %v157_v57  ;;  %v167_v20 = vand.u32 2147483647, %v157_v57  ;;  %vm163_vm6 = vweird.f32 %v157_v57 }
  0xb0   :  { %v120_v58 = vsub.f32 1.0, %v119_v55  ;;  %v147_v25 = vmul.f32 %v146_v10, %v478_v17  ;;  %v180_v17 = vld [vmem:[#allocation2 + $0x8] sm:$0xff] }
  0xb1   :  { %v170_v23 = vor.u32 1.1754944e-38, %v169_v16  ;;  %vm168_vm8 = vcmp.eq.f32.partialorder %v167_v20, 8.507059e+37 }
  0xb2   :  { %v121_v60 = vmul.f32 %v369_v53, %v120_v58 }
  0xb4   :  { %v122_v0 = vadd.f32 %v369_v53, %v121_v60 }
  0xb5   :  { %v371_v4 = vpop.eup %370 }
  0xb6   :  { %v126_v5 = vsel %vm125_vm3, %v369_v53, %v122_v0  ;;  %v159_v11 = vmul.f32 %v371_v4, %v157_v57  ;;  %vm164_vm5 = vweird.f32 %v371_v4 }
  0xb7   :  { %v131_v12 = vsel %vm128_vm4, %v130_v6, %v126_v5  ;;  %vm165_vm7 = vmor %vm163_vm6, %vm164_vm5 }
  0xb8   :  { %v160_v15 = vsub.f32 1.0, %v159_v11  ;;  %v132_v18 = vmul.f32 %v131_v12, %v107_v13 }
  0xba   :  { %v161_v19 = vmul.f32 %v371_v4, %v160_v15  ;;  %v334_v24 = vclamps-f32 %v132_v18, 1.0 }
  0xbc   :  { %v162_v21 = vadd.f32 %v371_v4, %v161_v19  ;;  %v175_v28 = vadd.f32 1.0, %v334_v24 }
  0xbe   :  { %v166_v22 = vsel %vm165_vm7, %v371_v4, %v162_v21  ;;  %v177_v32 = vmul.f32 %v175_v28, %v91_v29  ;;  %v366_v21 = vld [vmem:[%s530_s5] ss:$0 sm:$0xff] }
  0xbf   :  { %v171_v26 = vsel %vm168_vm8, %v170_v23, %v166_v22 }
  0xc0   :  { %v172_v27 = vmul.f32 %v171_v26, %v147_v25  ;;  %v367_v25 = vld [vmem:[%s531_s6] ss:$0 sm:$0xff] }
  0xc2   :  { %v335_v8 = vclamps-f32 %v172_v27, 1.0 }
  0xc4   :  { %v176_v31 = vadd.f32 1.0, %v335_v8 }
  0xc6   :  { %v178_v33 = vmul.f32 %v176_v31, %v92_v30 }
  0xc8   :  { %v181_v34 = vpack.c.bf16 %v178_v33, %v177_v32 }
  0xca   :  { %352 = vmatmul.msk.bf16.vlgmr.msra.gmra.mxu1 %vm214_vm9, %v181_v34 }
 0x147   :  { %v227_v36 = vpop.f32.mrf.mxu1 }
 0x148   :  { %v232_v37 = vadd.f32 %v227_v36, %v179_v35 }
 0x14a   :  { %234 = vst.msk [vmem:[#allocation2] sm:$0xff] %vm47_vm0, %v232_v37 }
 0x14f   :  { %v229_v38 = vpop.f32.mrf.mxu1 }
 0x150   :  { %v233_v39 = vadd.f32 %v229_v38, %v180_v17 }
 0x151   :  { %v241_v40 = vld [vmem:[#allocation2] sm:$0xff] }
 0x152   :  { %235 = vst.msk [vmem:[#allocation2 + $0x8] sm:$0xff] %vm47_vm0, %v233_v39  ;;  %v243_v14 = vadd.f32 %v241_v40, %v455_v2  ;;  %v408_v2 = vmov 32.0  }
 0x153   :  { %372 = vrcp.f32 %v408_v2 }
 0x154   :  { %v249_v41 = vadd.f32 %v365_v7, %v243_v14 }
 0x156   :  { %v253_v42 = vsel %vm47_vm0, %v249_v41, 0.0  ;;  %v268_v43 = vmul.f32 %v249_v41, %v249_v41 }
 0x157   :  { %254 = vadd.xlane.f32.xlu0 %v253_v42 }
 0x158   :  { %v270_v44 = vsel %vm47_vm0, %v268_v43, 0.0 }
 0x159   :  { %271 = vadd.xlane.f32.xlu1 %v270_v44  ;;  %v242_v45 = vld [vmem:[#allocation2 + $0x8] sm:$0xff]  ;;  %v373_v51 = vpop.eup %372 }
 0x15a   :  { %v244_v46 = vadd.f32 %v242_v45, %v460_v3  ;;  %v260_v52 = vmul.f32 32.0, %v373_v51  ;;  %vm264_vm10 = vweird.f32 %v373_v51 }
 0x15c   :  { %v250_v47 = vadd.f32 %v365_v7, %v244_v46  ;;  %v261_v53 = vsub.f32 1.0, %v260_v52 }
 0x15e   :  { %v256_v48 = vsel %vm47_vm0, %v250_v47, 0.0  ;;  %v269_v49 = vmul.f32 %v250_v47, %v250_v47  ;;  %v262_v54 = vmul.f32 %v373_v51, %v261_v53 }
 0x15f   :  { %257 = vadd.xlane.f32.xlu0 %v256_v48 }
 0x160   :  { %v273_v50 = vsel %vm47_vm0, %v269_v49, 0.0  ;;  %v263_v55 = vadd.f32 %v373_v51, %v262_v54 }
 0x161   :  { %274 = vadd.xlane.f32.xlu1 %v273_v50 }
 0x162   :  { %v265_v56 = vsel %vm264_vm10, %v373_v51, %v263_v55 }
 0x1ca   :  { %v255_v57 = vpop.xlane.xlu0 %254 }
 0x1cb   :  { %v266_v58 = vmul.f32 %v265_v56, %v255_v57 }
 0x1cc   :  { %v272_v3 = vpop.xlane.xlu1 %271 }
 0x1cd   :  { %v278_v59 = vmul.f32 %v266_v58, %v266_v58  ;;  %v276_v60 = vmul.f32 %v272_v3, %v265_v56  ;;  %v282_v20 = vsub.f32 %v249_v41, %v266_v58 }
 0x1cf   :  { %v280_v61 = vsub.f32 %v276_v60, %v278_v59 }
 0x1d1   :  { %v284_v62 = vadd.f32 1e-05, %v280_v61 }
 0x1d2   :  { %v258_v63 = vpop.xlane.xlu0 %257 }
 0x1d3   :  { %374 = vrsqrt.f32 %v284_v62  ;;  %v267_v0 = vmul.f32 %v265_v56, %v258_v63  ;;  %vm292_vm12 = vweird.f32 %v284_v62 }
 0x1d4   :  { %v275_v1 = vpop.xlane.xlu1 %274 }
 0x1d5   :  { %v279_v4 = vmul.f32 %v267_v0, %v267_v0  ;;  %v277_v5 = vmul.f32 %v275_v1, %v265_v56  ;;  %v283_v30 = vsub.f32 %v250_v47, %v267_v0 }
 0x1d7   :  { %v281_v6 = vsub.f32 %v277_v5, %v279_v4 }
 0x1d9   :  { %v375_v9 = vpop.eup %374  ;;  %v285_v11 = vadd.f32 1e-05, %v281_v6 }
 0x1da   :  { %v287_v12 = vmul.f32 %v375_v9, %v284_v62  ;;  %vm293_vm11 = vweird.f32 %v375_v9 }
 0x1db   :  { %376 = vrsqrt.f32 %v285_v11  ;;  %vm294_vm13 = vmor %vm292_vm12, %vm293_vm11  ;;  %vm302_vm15 = vweird.f32 %v285_v11 }
 0x1dc   :  { %v288_v13 = vmul.f32 %v375_v9, %v287_v12 }
 0x1de   :  { %v289_v15 = vmul.f32 0.5, %v288_v13 }
 0x1e0   :  { %v290_v10 = vsub.f32 1.5, %v289_v15 }
 0x1e1   :  { %v377_v16 = vpop.eup %376 }
 0x1e2   :  { %v291_v18 = vmul.f32 %v375_v9, %v290_v10  ;;  %v297_v19 = vmul.f32 %v377_v16, %v285_v11  ;;  %vm303_vm14 = vweird.f32 %v377_v16 }
 0x1e3   :  { %vm304_vm1 = vmor %vm302_vm15, %vm303_vm14 }
 0x1e4   :  { %v295_v23 = vsel %vm294_vm13, %v375_v9, %v291_v18  ;;  %v298_v24 = vmul.f32 %v377_v16, %v297_v19 }
 0x1e5   :  { %v306_v22 = vmul.f32 %v295_v23, %v282_v20 }
 0x1e6   :  { %v299_v26 = vmul.f32 0.5, %v298_v24 }
 0x1e7   :  { %v311_v27 = vmul.f32 %v366_v21, %v306_v22 }
 0x1e8   :  { %v300_v28 = vsub.f32 1.5, %v299_v26 }
 0x1e9   :  { %v316_v8 = vadd.f32 %v367_v25, %v311_v27 }
 0x1ea   :  { %v301_v29 = vmul.f32 %v377_v16, %v300_v28 }
 0x1eb   :  { %318 = vst.msk [vmem:[%s532_s7] sm:$0xff] %vm47_vm0, %v316_v8 }
 0x1ec   :  { %v305_v31 = vsel %vm304_vm1, %v377_v16, %v301_v29 }
 0x1ed   :  { %v307_v32 = vmul.f32 %v305_v31, %v283_v30 }
 0x1ef   :  { %v312_v33 = vmul.f32 %v366_v21, %v307_v32 }
 0x1f1   :  { %v317_v34 = vadd.f32 %v367_v25, %v312_v33 }
 0x1f3   :  { %319 = vst.msk [vmem:[%s532_s7 + $0x8] sm:$0xff] %vm47_vm0, %v317_v34 }
 0x1f4   :  { %324 = vsyncpa [#allocation4], 1 }

// kernel: _lambda_.3
= control target key start
LH: loop header
LB: loop body
LE: loop exit
PB: predicated region body
PF: predicated region fallthrough
CT: control target
= control target key end

     0   :  { %13 = vsyncpa [#allocation4], 0  ;;  %s1002_s27 = smov 0   ;;  %s1114_s0 = inlined_call_operand.vmem [shape: f32[2,8,32], index: 0, kind: input, shape index: {}]   ;;  %s1115_s1 = inlined_call_operand.hbm [shape: f32[8,8], index: 1, kind: input, shape index: {}]   ;;  %s1116_s2 = inlined_call_operand.vmem [shape: bf16[32,96], index: 2, kind: input, shape index: {}]   ;;  %s1117_s3 = inlined_call_operand.vmem [shape: f32[1,96], index: 3, kind: input, shape index: {}]   ;;  %s1118_s4 = inlined_call_operand.vmem [shape: bf16[32,32], index: 4, kind: input, shape index: {}]   ;;  %s1119_s5 = inlined_call_operand.vmem [shape: f32[1,32], index: 5, kind: input, shape index: {}, may-alias: {5,7}]   ;;  %s1120_s6 = inlined_call_operand.vmem [shape: f32[1,32], index: 6, kind: input, shape index: {}]   ;;  %s1121_s7 = inlined_call_operand.vmem [shape: f32[1,32], index: 7, kind: input, shape index: {}, may-alias: {5,7}]   ;;  %s1122_s8 = inlined_call_operand.vmem [shape: f32[2,8,32], index: 8, kind: output, shape index: {}]  }
   0x1 LB: > { %s800_s28 = sadd.s32 4294967295, %s939_s27   ;;  %p802_p0 = scmp.ge.s32.totalorder %s939_s27, 1  ;;  %s939_s27 = sphi %s1002_s27, %s19_s27  }
   0x2   : > { %p223_p1 = scmp.lt.s32.totalorder %s939_s27, 3  ;;  %s235_s9 = sshll.u32 %s1115_s1, 4  ;;  %s236_s9 = int_to_ptr.hbm [resolvable:$true] %s235_s9 }
   0x3   : > { %p849_p3 = scmp.eq.s32.totalorder %s800_s28, 0  ;;  %s941_s10 = smov [#allocation3]  }
   0x4   : > { %p224_p2 = pnand %p802_p0, %p223_p1  ;;  %s237_s11 = sshll.u32 %s941_s10, 4  ;;  %s238_s11 = int_to_ptr.vmem [resolvable:$true] %s237_s11 }
   0x6   : > { %p845_p4 = pneg %p224_p2  ;;  %275 = sbr.rel (%p224_p2) target bundleno = 1242 (0x4da), region = 52 }
   0x8   : > { %p846_p5 = pnand %p849_p3, %p845_p4 }
   0xa   : > { %848 = dma.hbm_to_vmem [thread:$0]  (!%p846_p5), %s236_s9, 128, %s238_s11, [#allocation4]  }
   0xb   : > { %934 = dma.done.wait (%p849_p3), [#allocation4], 128  }
   0xc   : > { %936 = vsyncadd (%p849_p3), [#allocation4], 4294967168  ;;  %p308_p6 = scmp.lt.s32.totalorder %s800_s28, 1  ;;  %v838_v0 = vld [vmem:[%s1116_s2 + $0x8] sm:$0xff]  ;;  %v837_v1 = vld [vmem:[%s1116_s2] sm:$0xff]  ;;  %vm339_vm0 = vcmask 261120  }
   0xd   : > { %349 = vmatpush.bf16.msra.mxu0 %v838_v0  ;;  %v875_v4 = vld [vmem:[%s1117_s3] ss:$0 sm:$0xff]  ;;  %s942_s22 = smov 104   ;;  %s943_s23 = smov 120   ;;  %vm361_vm1 = vcmask 64512   ;;  %v356_v20 = vld [vmem:[#allocation3] sm:$0xff] }
   0xe   : > { %s1124_s28 = smov (!%p308_p6, %s800_s28), 1  ;;  %s944_s24 = smov 96   ;;  %vm411_vm2 = vcmask 1043456  }
   0xf   : > { %s807_s12 = sshll.u32 %s1124_s28, 3  ;;  %s945_s25 = smov 80  }
  0x10   : > { %s311_s15 = scalar_lea.vmem %s1114_s0, %s807_s12  ;;  %s946_s26 = smov 72  }
  0x11   : > { %v1027_v2 = vld [vmem:[%s311_s15] sm:$0xff]  ;;  %350 = vmatpush.bf16.msra.mxu0 %v837_v1  ;;  %s947_s29 = smov 88   ;;  %s948_s30 = smov 112  }
  0x12   : > { %v318_v3 = vpack.c.bf16 %v1027_v2, %v1027_v2  ;;  %s949_s9 = smov 64   ;;  %s950_s10 = smov 48  }
  0x13   : > { %s951_s11 = smov 56   ;;  %s952_s13 = smov 40  }
  0x14   : > { %817 = vmatmul.msk.bf16.vlgmr.msra.gmra.mxu0 %vm339_vm0, %v318_v3  ;;  %s953_s14 = smov 8   ;;  %s954_s15 = smov 16  }
  0x15   : > { %s955_s16 = smov 24  }
  0x91   : > { %v352_v5 = vpop.f32.mrf.mxu0 }
  0x92   : > { %v353_v6 = vadd.f32 %v875_v4, %v352_v5 }
  0x94   : > { %v1035_v7 = vpack.c.bf16 %v353_v6, %v353_v6 }
  0x96   : > { %579 = vrot.lane.b32.xlu2 %v1035_v7, %s942_s22  ;;  %429 = vrot.lane.b32.xlu1 %v1035_v7, %s943_s23 }
  0x97   : > { %359 = vrot.lane.b32.xlu0 %v1035_v7, %s944_s24 }
  0x99   : > { %v354_v8 = vpop.f32.mrf.mxu0 }
  0x9e   : > { %506 = vrot.lane.b32.xlu2 %v1035_v7, %s945_s25  ;;  %581 = vrot.lane.b32.xlu1 %v1035_v7, %s946_s26 }
  0x9f   : > { %431 = vrot.lane.b32.xlu0 %v1035_v7, %s947_s29 }
  0xa7   : > { %504 = vrot.lane.b32.xlu0 %v1035_v7, %s948_s30 }
  0xf0   : > { %v580_v9 = vpop.permute.xlu2 %579 }
  0xf8   : > { %v507_v10 = vpop.permute.xlu2 %506 }
  0xf9   : > { %v512_v11 = vsel %vm361_vm1, %v507_v10, 0 }
  0xfa   : > { %521 = vmatpush.bf16.xpose.msrb.mxu0 %v512_v11 }
 0x108   : > { %v430_v12 = vpop.permute.xlu1 %429 }
 0x109   : > { %v360_v13 = vpop.permute.xlu0 %359 }
 0x10a   : > { %v366_v14 = vsel %vm361_vm1, %v360_v13, 0 }
 0x10b   : > { %375 = vmatpush.bf16.xpose.msra.mxu1 %v366_v14 }
 0x110   : > { %v582_v15 = vpop.permute.xlu1 %581 }
 0x111   : > { %v432_v16 = vpop.permute.xlu0 %431  ;;  %v587_v17 = vsel %vm361_vm1, %v582_v15, 0 }
 0x112   : > { %818 = vmatmul.msk.bf16.vlgmr.msra.gmra.mxu1 %vm361_vm1, %v1035_v7  ;;  %v437_v18 = vsel %vm361_vm1, %v432_v16, 0 }
 0x113   : > { %446 = vmatpush.bf16.xpose.msra.mxu3 %v437_v18 }
 0x119   : > { %v505_v19 = vpop.permute.xlu0 %504 }
 0x11a   : > { %820 = vmatmul.msk.bf16.vlgmr.msra.gmra.mxu3 %vm361_vm1, %v430_v12  ;;  %822 = vmatmul.msk.bf16.vlgmr.msrb.gmra.mxu0 %vm361_vm1, %v505_v19 }
 0x11b   : > { %596 = vmatpush.bf16.xpose.msrb.mxu3 %v587_v17 }
 0x12a   : > { %824 = vmatmul.msk.bf16.vlgmr.msrb.gmra.mxu3 %vm361_vm1, %v580_v9 }
 0x18f   : > { %v377_v21 = vpop.f32.mrf.mxu1 }
 0x190   : > { %v378_v22 = vadd.f32 %v377_v21, %v356_v20 }
 0x192   : > { %v381_v23 = vsel %vm361_vm1, %v378_v22, -inf }
 0x193   : > { %382 = vmax.xlane.f32.xlu1 %v381_v23 }
 0x197   : > { %v379_v24 = vpop.f32.mrf.mxu1  ;;  %v523_v25 = vpop.f32.mrf.mxu0 }
 0x198   : > { %v524_v30 = vadd.f32 %v523_v25, %v356_v20 }
 0x19a   : > { %v527_v32 = vsel %vm361_vm1, %v524_v30, -inf }
 0x19d   : > { %v448_v26 = vpop.f32.mrf.mxu3 }
 0x19e   : > { %v449_v27 = vadd.f32 %v448_v26, %v356_v20 }
 0x19f   : > { %v525_v28 = vpop.f32.mrf.mxu0 }
 0x1a0   : > { %v452_v29 = vsel %vm361_vm1, %v449_v27, -inf }
 0x1a1   : > { %453 = vmax.xlane.f32.xlu2 %v452_v29 }
 0x1a5   : > { %v450_v31 = vpop.f32.mrf.mxu3 }
 0x1a9   : > { %528 = vmax.xlane.f32.xlu2 %v527_v32 }
 0x1ad   : > { %v598_v33 = vpop.f32.mrf.mxu3 }
 0x1ae   : > { %v599_v34 = vadd.f32 %v598_v33, %v356_v20 }
 0x1b0   : > { %v602_v35 = vsel %vm361_vm1, %v599_v34, -inf }
 0x1b1   : > { %603 = vmax.xlane.f32.xlu0 %v602_v35 }
 0x1b5   : > { %v600_v36 = vpop.f32.mrf.mxu3 }
 0x1c5   : > { %406 = vrot.lane.b32.xlu0 %v1035_v7, %s949_s9  ;;  %s315_s9 = scalar_lea.vmem %s1122_s8, %s807_s12 }
 0x1cd   : > { %552 = vrot.lane.b32.xlu0 %v1035_v7, %s950_s10 }
 0x206   : > { %v383_v37 = vpop.xlane.xlu1 %382 }
 0x207   : > { %v384_v38 = vsub.f32 %v378_v22, %v383_v37 }
 0x209   : > { %v385_v39 = vmul.f32 1.442695, %v384_v38 }
 0x20b   : > { %879 = vpow2.f32 %v385_v39 }
 0x211   : > { %v880_v40 = vpop.eup %879 }
 0x212   : > { %v387_v41 = vsel %vm361_vm1, %v880_v40, 0.0 }
 0x213   : > { %388 = vadd.xlane.f32.xlu1 %v387_v41 }
 0x214   : > { %v454_v42 = vpop.xlane.xlu2 %453 }
 0x215   : > { %v455_v43 = vsub.f32 %v449_v27, %v454_v42 }
 0x217   : > { %v456_v44 = vmul.f32 1.442695, %v455_v43 }
 0x219   : > { %881 = vpow2.f32 %v456_v44 }
 0x21c   : > { %v529_v45 = vpop.xlane.xlu2 %528 }
 0x21d   : > { %v530_v46 = vsub.f32 %v524_v30, %v529_v45 }
 0x21f   : > { %v1060_v47 = vpop.eup %881  ;;  %v531_v48 = vmul.f32 1.442695, %v530_v46 }
 0x220   : > { %v458_v49 = vsel %vm361_vm1, %v1060_v47, 0.0 }
 0x221   : > { %883 = vpow2.f32 %v531_v48  ;;  %459 = vadd.xlane.f32.xlu2 %v458_v49 }
 0x224   : > { %v604_v50 = vpop.xlane.xlu0 %603 }
 0x225   : > { %v605_v51 = vsub.f32 %v599_v34, %v604_v50 }
 0x227   : > { %v1064_v52 = vpop.eup %883  ;;  %v606_v53 = vmul.f32 1.442695, %v605_v51 }
 0x228   : > { %v533_v54 = vsel %vm361_vm1, %v1064_v52, 0.0 }
 0x229   : > { %885 = vpow2.f32 %v606_v53  ;;  %534 = vadd.xlane.f32.xlu1 %v533_v54 }
 0x22f   : > { %v1068_v55 = vpop.eup %885 }
 0x230   : > { %v608_v56 = vsel %vm361_vm1, %v1068_v55, 0.0 }
 0x231   : > { %609 = vadd.xlane.f32.xlu1 %v608_v56 }
 0x237   : > { %v407_v57 = vpop.permute.xlu0 %406 }
 0x238   : > { %v413_v58 = vsel %vm411_vm2, %v407_v57, 0 }
 0x239   : > { %477 = vrot.lane.b32.xlu2 %v1035_v7, %s951_s11  ;;  %422 = vmatpush.bf16.msra.mxu2 %v413_v58 }
 0x23f   : > { %v553_v59 = vpop.permute.xlu0 %552 }
 0x240   : > { %v558_v60 = vsel %vm411_vm2, %v553_v59, 0 }
 0x241   : > { %567 = vmatpush.bf16.msrb.mxu1 %v558_v60 }
 0x24a   : > { %627 = vrot.lane.b32.xlu1 %v1035_v7, %s952_s13 }
 0x286   : > { %v389_v61 = vpop.xlane.xlu1 %388 }
 0x287   : > { %887 = vrcp.f32 %v389_v61  ;;  %v401_v1 = vand.u32 2147483648, %v389_v61  ;;  %v399_v4 = vand.u32 2147483647, %v389_v61  ;;  %vm395_vm4 = vweird.f32 %v389_v61 }
 0x289   : > { %v402_v8 = vor.u32 1.1754944e-38, %v401_v1  ;;  %vm400_vm6 = vcmp.eq.f32.partialorder %v399_v4, 8.507059e+37 }
 0x28d   : > { %v888_v62 = vpop.eup %887 }
 0x28e   : > { %v391_v63 = vmul.f32 %v888_v62, %v389_v61  ;;  %vm396_vm3 = vweird.f32 %v888_v62 }
 0x28f   : > { %vm397_vm5 = vmor %vm395_vm4, %vm396_vm3 }
 0x290   : > { %v392_v0 = vsub.f32 1.0, %v391_v63  ;;  %v839_v63 = vld [vmem:[%s1118_s4] sm:$0xff] }
 0x292   : > { %v393_v3 = vmul.f32 %v888_v62, %v392_v0 }
 0x294   : > { %v460_v5 = vpop.xlane.xlu2 %459  ;;  %v394_v6 = vadd.f32 %v888_v62, %v393_v3 }
 0x295   : > { %889 = vrcp.f32 %v460_v5  ;;  %v472_v19 = vand.u32 2147483648, %v460_v5  ;;  %v470_v20 = vand.u32 2147483647, %v460_v5  ;;  %vm466_vm8 = vweird.f32 %v460_v5 }
 0x296   : > { %v398_v9 = vsel %vm397_vm5, %v888_v62, %v394_v6  ;;  %v840_v62 = vld [vmem:[%s1118_s4 + $0x8] sm:$0xff]  ;;  %v876_v6 = vld [vmem:[%s1119_s5] ss:$0 sm:$0xff] }
 0x297   : > { %v403_v10 = vsel %vm400_vm6, %v402_v8, %v398_v9  ;;  %v473_v23 = vor.u32 1.1754944e-38, %v472_v19  ;;  %vm471_vm10 = vcmp.eq.f32.partialorder %v470_v20, 8.507059e+37  ;;  %685 = vmatpush.bf16.msra.mxu0 %v840_v62  ;;  %vm652_vm6 = vcmask 261312  }
 0x298   : > { %v404_v11 = vmul.f32 %v880_v40, %v403_v10 }
 0x29a   : > { %v405_v7 = vpack.c.bf16 %v404_v11, %v404_v11 }
 0x29b   : > { %v890_v12 = vpop.eup %889  ;;  %686 = vmatpush.bf16.msra.mxu0 %v839_v63 }
 0x29c   : > { %v462_v13 = vmul.f32 %v890_v12, %v460_v5  ;;  %v535_v14 = vpop.xlane.xlu1 %534  ;;  %v478_v15 = vpop.permute.xlu2 %477  ;;  %819 = vmatmul.msk.bf16.vlgmr.msra.gmra.mxu2 %vm361_vm1, %v405_v7  ;;  %vm467_vm7 = vweird.f32 %v890_v12 }
 0x29d   : > { %891 = vrcp.f32 %v535_v14  ;;  %v483_v17 = vsel %vm411_vm2, %v478_v15, 0  ;;  %vm468_vm9 = vmor %vm466_vm8, %vm467_vm7  ;;  %v547_v29 = vand.u32 2147483648, %v535_v14  ;;  %v545_v32 = vand.u32 2147483647, %v535_v14 }
 0x29e   : > { %v463_v16 = vsub.f32 1.0, %v462_v13  ;;  %492 = vmatpush.bf16.msrb.mxu2 %v483_v17  ;;  %vm541_vm12 = vweird.f32 %v535_v14 }
 0x29f   : > { %v548_v36 = vor.u32 1.1754944e-38, %v547_v29  ;;  %vm546_vm14 = vcmp.eq.f32.partialorder %v545_v32, 8.507059e+37 }
 0x2a0   : > { %v464_v18 = vmul.f32 %v890_v12, %v463_v16 }
 0x2a2   : > { %v465_v21 = vadd.f32 %v890_v12, %v464_v18 }
 0x2a3   : > { %v892_v22 = vpop.eup %891 }
 0x2a4   : > { %v537_v24 = vmul.f32 %v892_v22, %v535_v14  ;;  %v610_v25 = vpop.xlane.xlu1 %609  ;;  %v469_v26 = vsel %vm468_vm9, %v890_v12, %v465_v21  ;;  %vm542_vm11 = vweird.f32 %v892_v22  ;;  %v956_v14 = vmov 32.0  }
 0x2a5   : > { %893 = vrcp.f32 %v610_v25  ;;  %v474_v28 = vsel %vm471_vm10, %v473_v23, %v469_v26  ;;  %vm543_vm13 = vmor %vm541_vm12, %vm542_vm11  ;;  %v622_v45 = vand.u32 2147483648, %v610_v25  ;;  %vm616_vm3 = vweird.f32 %v610_v25 }
 0x2a6   : > { %v538_v27 = vsub.f32 1.0, %v537_v24  ;;  %v475_v30 = vmul.f32 %v1060_v47, %v474_v28  ;;  %v620_v46 = vand.u32 2147483647, %v610_v25  ;;  %895 = vrcp.f32 %v956_v14 }
 0x2a7   : > { %v623_v48 = vor.u32 1.1754944e-38, %v622_v45 }
 0x2a8   : > { %v539_v31 = vmul.f32 %v892_v22, %v538_v27  ;;  %v476_v34 = vpack.c.bf16 %v475_v30, %v475_v30  ;;  %vm621_vm5 = vcmp.eq.f32.partialorder %v620_v46, 8.507059e+37 }
 0x2aa   : > { %v540_v33 = vadd.f32 %v892_v22, %v539_v31 }
 0x2ab   : > { %v894_v35 = vpop.eup %893 }
 0x2ac   : > { %v612_v37 = vmul.f32 %v894_v35, %v610_v25  ;;  %821 = vmatmul.msk.bf16.vlgmr.msrb.gmra.mxu2 %vm361_vm1, %v476_v34  ;;  %v544_v38 = vsel %vm543_vm13, %v892_v22, %v540_v33  ;;  %vm617_vm15 = vweird.f32 %v894_v35  ;;  %v896_v15 = vpop.eup %895  ;;  %v877_v34 = vld [vmem:[%s1120_s6] ss:$0 sm:$0xff] }
 0x2ad   : > { %v549_v39 = vsel %vm546_vm14, %v548_v36, %v544_v38  ;;  %vm618_vm4 = vmor %vm616_vm3, %vm617_vm15  ;;  %v699_v16 = vmul.f32 32.0, %v896_v15  ;;  %vm703_vm7 = vweird.f32 %v896_v15  ;;  %v878_v36 = vld [vmem:[%s1121_s7] ss:$0 sm:$0xff] }
 0x2ae   : > { %v613_v40 = vsub.f32 1.0, %v612_v37  ;;  %v550_v41 = vmul.f32 %v1064_v52, %v549_v39 }
 0x2af   : > { %v700_v17 = vsub.f32 1.0, %v699_v16 }
 0x2b0   : > { %v614_v42 = vmul.f32 %v894_v35, %v613_v40  ;;  %v551_v43 = vpack.c.bf16 %v550_v41, %v550_v41 }
 0x2b1   : > { %v701_v18 = vmul.f32 %v896_v15, %v700_v17 }
 0x2b2   : > { %v615_v44 = vadd.f32 %v894_v35, %v614_v42  ;;  %823 = vmatmul.msk.bf16.vlgmr.msrb.gmra.mxu1 %vm361_vm1, %v551_v43 }
 0x2b3   : > { %v702_v19 = vadd.f32 %v896_v15, %v701_v18 }
 0x2b4   : > { %v619_v47 = vsel %vm618_vm4, %v894_v35, %v615_v44 }
 0x2b5   : > { %v624_v49 = vsel %vm621_vm5, %v623_v48, %v619_v47  ;;  %v704_v20 = vsel %vm703_vm7, %v896_v15, %v702_v19 }
 0x2b6   : > { %v625_v50 = vmul.f32 %v1068_v55, %v624_v49 }
 0x2b8   : > { %v626_v52 = vpack.c.bf16 %v625_v50, %v625_v50 }
 0x2bc   : > { %v628_v51 = vpop.permute.xlu1 %627 }
 0x2bd   : > { %v633_v53 = vsel %vm411_vm2, %v628_v51, 0  ;;  %vm577_vm2 = vcmask 195712  }
 0x2be   : > { %642 = vmatpush.bf16.msra.mxu2 %v633_v53 }
 0x2c1   : > { %825 = vmatmul.msk.bf16.vlgmr.msra.gmra.mxu2 %vm361_vm1, %v626_v52 }
 0x31f   : > { %v424_v54 = vpop.f32.mrf.mxu2 }
 0x320   : > { %428 = vst.msk [vmem:[#allocation2] sm:$0xff] %vm361_vm1, %v424_v54  ;;  %vm502_vm1 = vcmask 130112  }
 0x327   : > { %v426_v56 = vpop.f32.mrf.mxu2 }
 0x32f   : > { %v494_v57 = vpop.f32.mrf.mxu2  ;;  %v569_v58 = vpop.f32.mrf.mxu1 }
 0x330   : > { %499 = vrot.lane.b32.xlu0 %v494_v57, %s953_s14  ;;  %574 = vrot.lane.b32.xlu2 %v569_v58, %s954_s15 }
 0x337   : > { %v496_v59 = vpop.f32.mrf.mxu2  ;;  %v571_v60 = vpop.f32.mrf.mxu1 }
 0x344   : > { %v644_v55 = vpop.f32.mrf.mxu2 }
 0x345   : > { %649 = vrot.lane.b32.xlu0 %v644_v55, %s955_s16 }
 0x34c   : > { %v646_v61 = vpop.f32.mrf.mxu2 }
 0x38a   : > { %v575_v1 = vpop.permute.xlu2 %574 }
 0x3a2   : > { %v500_v0 = vpop.permute.xlu0 %499 }
 0x3a3   : > { %503 = vst.msk [vmem:[#allocation2] sm:$0xff] %vm502_vm1, %v500_v0 }
 0x3a4   : > { %578 = vst.msk [vmem:[#allocation2] sm:$0xff] %vm577_vm2, %v575_v1 }
 0x3b7   : > { %v650_v3 = vpop.permute.xlu0 %649 }
 0x3b8   : > { %653 = vst.msk [vmem:[#allocation2] sm:$0xff] %vm652_vm6, %v650_v3 }
 0x3bf   : > { %v654_v4 = vld [vmem:[#allocation2] sm:$0xff] }
 0x3c0   : > { %v655_v5 = vpack.c.bf16 %v654_v4, %v654_v4 }
 0x3c2   : > { %834 = vmatmul.msk.bf16.vlgmr.msra.gmra.mxu0 %vm339_vm0, %v655_v5 }
 0x43f   : > { %v688_v8 = vpop.f32.mrf.mxu0 }
 0x440   : > { %v689_v9 = vadd.f32 %v876_v6, %v688_v8 }
 0x442   : > { %v692_v10 = vadd.f32 %v689_v9, %v1027_v2 }
 0x444   : > { %v695_v11 = vsel %vm339_vm0, %v692_v10, 0.0  ;;  %v706_v7 = vmul.f32 %v692_v10, %v692_v10 }
 0x445   : > { %696 = vadd.xlane.f32.xlu2 %v695_v11 }
 0x446   : > { %v707_v12 = vsel %vm339_vm0, %v706_v7, 0.0 }
 0x447   : > { %v690_v13 = vpop.f32.mrf.mxu0  ;;  %708 = vadd.xlane.f32.xlu1 %v707_v12 }
 0x4b8   : > { %v697_v21 = vpop.xlane.xlu2 %696 }
 0x4b9   : > { %v705_v22 = vmul.f32 %v704_v20, %v697_v21 }
 0x4ba   : > { %v709_v2 = vpop.xlane.xlu1 %708 }
 0x4bb   : > { %v711_v23 = vmul.f32 %v705_v22, %v705_v22  ;;  %v710_v24 = vmul.f32 %v709_v2, %v704_v20  ;;  %v713_v33 = vsub.f32 %v692_v10, %v705_v22 }
 0x4bd   : > { %v712_v25 = vsub.f32 %v710_v24, %v711_v23 }
 0x4bf   : > { %v714_v26 = vadd.f32 1e-05, %v712_v25 }
 0x4c1   : > { %897 = vrsqrt.f32 %v714_v26  ;;  %vm721_vm9 = vweird.f32 %v714_v26 }
 0x4c7   : > { %v898_v27 = vpop.eup %897 }
 0x4c8   : > { %v716_v28 = vmul.f32 %v898_v27, %v714_v26  ;;  %vm722_vm8 = vweird.f32 %v898_v27 }
 0x4c9   : > { %vm723_vm10 = vmor %vm721_vm9, %vm722_vm8 }
 0x4ca   : > { %v717_v29 = vmul.f32 %v898_v27, %v716_v28 }
 0x4cc   : > { %v718_v30 = vmul.f32 0.5, %v717_v29 }
 0x4ce   : > { %v719_v31 = vsub.f32 1.5, %v718_v30 }
 0x4d0   : > { %v720_v32 = vmul.f32 %v898_v27, %v719_v31 }
 0x4d2   : > { %v724_v35 = vsel %vm723_vm10, %v898_v27, %v720_v32 }
 0x4d3   : > { %v725_v37 = vmul.f32 %v724_v35, %v713_v33 }
 0x4d5   : > { %v729_v38 = vmul.f32 %v877_v34, %v725_v37 }
 0x4d7   : > { %v733_v39 = vadd.f32 %v878_v36, %v729_v38 }
 0x4d9   : > { %734 = vst.msk [vmem:[%s315_s9] sm:$0xff] %vm339_vm0, %v733_v39 }
 0x4da PF: > { %s19_s27 = sadd.s32 1, %s939_s27  }
 0x4db   : > { %p16_p7 = scmp.ge.s32.totalorder %s19_s27, 4  }
 0x4dd   :  { %18 = sbr.rel (!%p16_p7) target bundleno = 1 (0x1), region = 87 }
 0x4e2   :  { %754 = vsyncpa [#allocation4], 1 }
 0x4e3   :  { %756 = vsyncpa [#allocation4 + $0x1], 1 }

// kernel: _lambda_.4
= control target key start
LH: loop header
LB: loop body
LE: loop exit
PB: predicated region body
PF: predicated region fallthrough
CT: control target
= control target key end

     0   :  { %15 = vsyncpa [#allocation4], 0  ;;  %s1500_s0 = inlined_call_operand.vmem [shape: f32[2,8,32], index: 0, kind: input, shape index: {}]   ;;  %s1501_s1 = inlined_call_operand.vmem [shape: f32[2,8,32], index: 1, kind: input, shape index: {}]   ;;  %s1502_s2 = inlined_call_operand.hbm [shape: bf16[32,64], index: 2, kind: input, shape index: {}]   ;;  %s1503_s3 = inlined_call_operand.hbm [shape: f32[1,64], index: 3, kind: input, shape index: {}]   ;;  %s1504_s4 = inlined_call_operand.hbm [shape: bf16[32,32], index: 4, kind: input, shape index: {}]   ;;  %s1505_s5 = inlined_call_operand.vmem [shape: f32[1,32], index: 5, kind: input, shape index: {}]   ;;  %s1506_s6 = inlined_call_operand.hbm [shape: bf16[32,32], index: 6, kind: input, shape index: {}]   ;;  %s1507_s7 = inlined_call_operand.vmem [shape: f32[1,32], index: 7, kind: input, shape index: {}, may-alias: {7,9}]   ;;  %s1508_s8 = inlined_call_operand.vmem [shape: f32[1,32], index: 8, kind: input, shape index: {}]   ;;  %s1509_s9 = inlined_call_operand.vmem [shape: f32[1,32], index: 9, kind: input, shape index: {}, may-alias: {7,9}]   ;;  %s1510_s10 = inlined_call_operand.vmem [shape: f32[2,8,32], index: 10, kind: output, shape index: {}]  }
   0x1   :  { %16 = vsyncpa [#allocation6], 0 }
   0x2   :  { %17 = vsyncpa [#allocation9], 0  ;;  %s1357_s13 = smov 0  }
   0x3 LB: > { %s300_s16 = sshll.u32 %s1503_s3, 4  ;;  %s1366_s17 = sadd.s32 4294967295, %s1283_s13   ;;  %s1283_s13 = sphi %s1357_s13, %s23_s13   ;;  %s301_s16 = int_to_ptr.hbm [resolvable:$true] %s300_s16 }
   0x4   : > { %p1001_p0 = scmp.ge.s32.totalorder %s1283_s13, 1  ;;  %p274_p1 = scmp.lt.s32.totalorder %s1283_s13, 3 }
   0x5   : > { %p1087_p2 = scmp.eq.s32.totalorder %s1366_s17, 0  ;;  %s1285_s19 = smov [#allocation5]  }
   0x6   : > { %p1371_p3 = pnand %p1001_p0, %p274_p1  ;;  %s302_s20 = sshll.u32 %s1285_s19, 4  ;;  %s303_s20 = int_to_ptr.vmem [resolvable:$true] %s302_s20 }
   0x7   : > { %s285_s23 = sshll.u32 %s1502_s2, 4  ;;  %s1286_s25 = smov [#allocation3]   ;;  %s286_s23 = int_to_ptr.hbm [resolvable:$true] %s285_s23 }
   0x8   : > { %p1074_p4 = pneg %p1371_p3  ;;  %s287_s26 = sshll.u32 %s1286_s25, 4  ;;  %s288_s26 = int_to_ptr.vmem [resolvable:$true] %s287_s26 }
   0x9   : > { %s311_s29 = sshll.u32 %s1504_s4, 4  ;;  %s1287_s30 = smov 64   ;;  %s312_s29 = int_to_ptr.hbm [resolvable:$true] %s311_s29 }
   0xa   : > { %p1382_p5 = pnand %p1087_p2, %p1074_p4  ;;  %s1288_s11 = smov 4  }
   0xb   : > { %s1289_s12 = smov [#allocation7]   ;;  %s328_s21 = sshll.u32 %s1506_s6, 4  ;;  %s329_s21 = int_to_ptr.hbm [resolvable:$true] %s328_s21 }
   0xc   : > { %1080 = dma.hbm_to_vmem [thread:$0]  (!%p1382_p5), %s301_s16, 16, %s303_s20, [#allocation6]  }
   0xd   : > { %1077 = dma.hbm_to_vmem [thread:$0]  (!%p1382_p5), %s286_s23, 256, %s288_s26, [#allocation4], %s1287_s30, %s1287_s30, %s1288_s11  }
   0xe   : > { %s313_s14 = sshll.u32 %s1289_s12, 4  ;;  %s1290_s22 = smov [#allocation8]   ;;  %s314_s14 = int_to_ptr.vmem [resolvable:$true] %s313_s14 }
   0xf   : > { %1083 = dma.hbm_to_vmem [thread:$0]  (!%p1382_p5), %s312_s29, 256, %s314_s14, [#allocation6], %s1287_s30, %s1287_s30, %s1288_s11  }
  0x10   : > { %s330_s25 = sshll.u32 %s1290_s22, 4  ;;  %369 = sbr.rel (%p1371_p3) target bundleno = 1632 (0x660), region = 60  ;;  %s331_s25 = int_to_ptr.vmem [resolvable:$true] %s330_s25 }
  0x11   : > { %1086 = dma.hbm_to_vmem [thread:$0]  (!%p1382_p5), %s329_s21, 256, %s331_s25, [#allocation9], %s1287_s30, %s1287_s30, %s1288_s11  }
  0x15   : > { %1270 = dma.done.wait (%p1087_p2), [#allocation4], 256  }
  0x16   : > { %1272 = vsyncadd (%p1087_p2), [#allocation4], 4294967040 }
  0x17   : > { %1274 = dma.done.wait (%p1087_p2), [#allocation6], 272  }
  0x18   : > { %1276 = vsyncadd (%p1087_p2), [#allocation6], 4294967024 }
  0x19   : > { %1278 = dma.done.wait (%p1087_p2), [#allocation9], 256  }
  0x1a   : > { %1280 = vsyncadd (%p1087_p2), [#allocation9], 4294967040  ;;  %p425_p6 = scmp.lt.s32.totalorder %s1366_s17, 1  ;;  %v1053_v0 = vld [vmem:[#allocation3 + $0x8] sm:$0xff]  ;;  %v1052_v1 = vld [vmem:[#allocation3] sm:$0xff]  ;;  %vm460_vm0 = vcmask 261120  }
  0x1b   : > { %470 = vmatpush.bf16.msra.mxu0 %v1053_v0  ;;  %v1120_v4 = vld [vmem:[#allocation5] ss:$0 sm:$0xff]  ;;  %s1292_s24 = smov 96   ;;  %s1293_s26 = smov 80   ;;  %v1055_v9 = vld [vmem:[#allocation7 + $0x8] sm:$0xff]  ;;  %v1054_v10 = vld [vmem:[#allocation7] sm:$0xff] }
  0x1c   : > { %s1514_s17 = smov (!%p425_p6, %s1366_s17), 1  ;;  %s1294_s27 = smov 72   ;;  %508 = vmatpush.bf16.msra.mxu1 %v1055_v9  ;;  %vm519_vm1 = vcmask 64512   ;;  %v1121_v25 = vld [vmem:[%s1505_s5] ss:$0 sm:$0xff]  ;;  %vm568_vm2 = vcmask 1043456  }
  0x1d   : > { %s1416_s16 = sshll.u32 %s1514_s17, 3  ;;  %s1291_s17 = smov 120  }
  0x1e   : > { %s428_s23 = scalar_lea.vmem %s1500_s0, %s1416_s16  ;;  %s1295_s28 = smov 112  }
  0x1f   : > { %v1422_v2 = vld [vmem:[%s428_s23] sm:$0xff]  ;;  %471 = vmatpush.bf16.msra.mxu0 %v1052_v1  ;;  %s1296_s29 = smov 104   ;;  %s432_s12 = scalar_lea.vmem %s1501_s1, %s1416_s16 }
  0x20   : > { %v439_v3 = vpack.c.bf16 %v1422_v2, %v1422_v2  ;;  %509 = vmatpush.bf16.msra.mxu1 %v1054_v10  ;;  %v477_v11 = vld [vmem:[%s432_s12] sm:$0xff]  ;;  %s1297_s19 = smov 88   ;;  %s1298_s21 = smov 16  }
  0x21   : > { %v478_v12 = vpack.c.bf16 %v477_v11, %v477_v11  ;;  %s1299_s22 = smov 8   ;;  %s1300_s25 = smov 24  }
  0x22   : > { %1023 = vmatmul.msk.bf16.vlgmr.msra.gmra.mxu0 %vm460_vm0, %v439_v3 }
  0x23   : > { %1032 = vmatmul.msk.bf16.vlgmr.msra.gmra.mxu1 %vm460_vm0, %v478_v12 }
  0x9f   : > { %v473_v5 = vpop.f32.mrf.mxu0 }
  0xa0   : > { %v474_v6 = vadd.f32 %v1120_v4, %v473_v5  ;;  %v511_v20 = vpop.f32.mrf.mxu1 }
  0xa1   : > { %v512_v28 = vadd.f32 %v1121_v25, %v511_v20 }
  0xa2   : > { %v515_v7 = vpack.c.bf16 %v474_v6, %v474_v6 }
  0xa3   : > { %v1449_v29 = vpack.c.bf16 %v512_v28, %v512_v28 }
  0xa4   : > { %586 = vrot.lane.b32.xlu2 %v515_v7, %s1291_s17  ;;  %517 = vrot.lane.b32.xlu0 %v515_v7, %s1292_s24 }
  0xa5   : > { %v570_v36 = vsel %vm568_vm2, %v1449_v29, 0 }
  0xa6   : > { %579 = vmatpush.bf16.msra.mxu3 %v570_v36 }
  0xa7   : > { %v475_v8 = vpop.f32.mrf.mxu0 }
  0xa8   : > { %v513_v21 = vpop.f32.mrf.mxu1 }
  0xac   : > { %664 = vrot.lane.b32.xlu2 %v515_v7, %s1293_s26 }
  0xb4   : > { %739 = vrot.lane.b32.xlu2 %v515_v7, %s1294_s27 }
  0xbc   : > { %662 = vrot.lane.b32.xlu2 %v515_v7, %s1295_s28 }
  0xc4   : > { %737 = vrot.lane.b32.xlu2 %v515_v7, %s1296_s29 }
  0xfe   : > { %v1435_v13 = vpop.permute.xlu2 %586 }
 0x106   : > { %v665_v14 = vpop.permute.xlu2 %664 }
 0x107   : > { %v670_v15 = vsel %vm519_vm1, %v665_v14, 0 }
 0x108   : > { %679 = vmatpush.bf16.xpose.msrb.mxu1 %v670_v15 }
 0x10e   : > { %v740_v16 = vpop.permute.xlu2 %739 }
 0x10f   : > { %v745_v56 = vsel %vm519_vm1, %v740_v16, 0 }
 0x116   : > { %v663_v17 = vpop.permute.xlu2 %662  ;;  %v518_v18 = vpop.permute.xlu0 %517 }
 0x117   : > { %1037 = vmatmul.msk.bf16.vlgmr.msrb.gmra.mxu1 %vm519_vm1, %v663_v17  ;;  %v524_v19 = vsel %vm519_vm1, %v518_v18, 0 }
 0x118   : > { %533 = vmatpush.bf16.xpose.msra.mxu2 %v524_v19 }
 0x11e   : > { %v738_v38 = vpop.permute.xlu2 %737 }
 0x11f   : > { %1033 = vmatmul.msk.bf16.vlgmr.msra.gmra.mxu2 %vm519_vm1, %v515_v7 }
 0x194   : > { %v1441_v22 = vpop.f32.mrf.mxu1 }
 0x195   : > { %v685_v23 = vsel %vm519_vm1, %v1441_v22, -inf }
 0x196   : > { %686 = vmax.xlane.f32.xlu2 %v685_v23 }
 0x19c   : > { %v683_v24 = vpop.f32.mrf.mxu1 }
 0x1a2   : > { %v535_v26 = vpop.f32.mrf.mxu2 }
 0x1a3   : > { %v539_v27 = vsel %vm519_vm1, %v535_v26, -inf }
 0x1a4   : > { %540 = vmax.xlane.f32.xlu0 %v539_v27 }
 0x1aa   : > { %v537_v30 = vpop.f32.mrf.mxu2 }
 0x1ae   : > { %710 = vrot.lane.b32.xlu2 %v1449_v29, %s1295_s28 }
 0x209   : > { %v687_v45 = vpop.xlane.xlu2 %686 }
 0x20a   : > { %v688_v61 = vsub.f32 %v1441_v22, %v687_v45 }
 0x20c   : > { %v689_v63 = vmul.f32 1.442695, %v688_v61 }
 0x211   : > { %v711_v52 = vpop.permute.xlu2 %710 }
 0x212   : > { %v716_v53 = vsel %vm568_vm2, %v711_v52, 0 }
 0x213   : > { %725 = vmatpush.bf16.msrb.mxu2 %v716_v53 }
 0x217   : > { %v541_v31 = vpop.xlane.xlu0 %540 }
 0x218   : > { %v542_v32 = vsub.f32 %v535_v26, %v541_v31 }
 0x21a   : > { %v543_v33 = vmul.f32 1.442695, %v542_v32 }
 0x21c   : > { %1125 = vpow2.f32 %v543_v33 }
 0x222   : > { %v1126_v34 = vpop.eup %1125 }
 0x223   : > { %v545_v35 = vsel %vm519_vm1, %v1126_v34, 0.0 }
 0x224   : > { %546 = vadd.xlane.f32.xlu1 %v545_v35 }
 0x23d   : > { %588 = vrot.lane.b32.xlu1 %v515_v7, %s1297_s19 }
 0x297   : > { %v547_v37 = vpop.xlane.xlu1 %546 }
 0x298   : > { %1127 = vrcp.f32 %v547_v37  ;;  %v559_v42 = vand.u32 2147483648, %v547_v37  ;;  %v557_v44 = vand.u32 2147483647, %v547_v37  ;;  %vm553_vm4 = vweird.f32 %v547_v37 }
 0x299   : > { %1129 = vpow2.f32 %v689_v63 }
 0x29a   : > { %v560_v47 = vor.u32 1.1754944e-38, %v559_v42  ;;  %vm558_vm6 = vcmp.eq.f32.partialorder %v557_v44, 8.507059e+37 }
 0x29e   : > { %v1128_v39 = vpop.eup %1127 }
 0x29f   : > { %v549_v40 = vmul.f32 %v1128_v39, %v547_v37  ;;  %vm554_vm3 = vweird.f32 %v1128_v39  ;;  %v1130_v3 = vpop.eup %1129 }
 0x2a0   : > { %vm555_vm5 = vmor %vm553_vm4, %vm554_vm3  ;;  %v691_v5 = vsel %vm519_vm1, %v1130_v3, 0.0 }
 0x2a1   : > { %v550_v41 = vsub.f32 1.0, %v549_v40 }
 0x2a3   : > { %v551_v43 = vmul.f32 %v1128_v39, %v550_v41 }
 0x2a5   : > { %v552_v46 = vadd.f32 %v1128_v39, %v551_v43 }
 0x2a7   : > { %v556_v48 = vsel %vm555_vm5, %v1128_v39, %v552_v46 }
 0x2a8   : > { %v561_v49 = vsel %vm558_vm6, %v560_v47, %v556_v48  ;;  %vm735_vm6 = vcmask 195712  }
 0x2a9   : > { %v562_v50 = vmul.f32 %v1126_v34, %v561_v49 }
 0x2ab   : > { %v563_v51 = vpack.c.bf16 %v562_v50, %v562_v50 }
 0x2ad   : > { %1034 = vmatmul.msk.bf16.vlgmr.msra.gmra.mxu3 %vm519_vm1, %v563_v51 }
 0x2af   : > { %v589_v54 = vpop.permute.xlu1 %588 }
 0x2b0   : > { %v594_v55 = vsel %vm519_vm1, %v589_v54, 0 }
 0x2b1   : > { %603 = vmatpush.bf16.xpose.msrb.mxu3 %v594_v55 }
 0x2b9   : > { %754 = vmatpush.bf16.xpose.msra.mxu3 %v745_v56 }
 0x2bd   : > { %1035 = vmatmul.msk.bf16.vlgmr.msrb.gmra.mxu3 %vm519_vm1, %v1435_v13 }
 0x2cd   : > { %1039 = vmatmul.msk.bf16.vlgmr.msra.gmra.mxu3 %vm519_vm1, %v738_v38 }
 0x330   : > { %v581_v57 = vpop.f32.mrf.mxu3 }
 0x331   : > { %585 = vst.msk [vmem:[#allocation2] sm:$0xff] %vm519_vm1, %v581_v57 }
 0x338   : > { %v583_v58 = vpop.f32.mrf.mxu3 }
 0x340   : > { %v605_v59 = vpop.f32.mrf.mxu3 }
 0x341   : > { %v609_v60 = vsel %vm519_vm1, %v605_v59, -inf }
 0x342   : > { %610 = vmax.xlane.f32.xlu1 %v609_v60 }
 0x348   : > { %v607_v62 = vpop.f32.mrf.mxu3 }
 0x350   : > { %v756_v0 = vpop.f32.mrf.mxu3 }
 0x351   : > { %v760_v1 = vsel %vm519_vm1, %v756_v0, -inf }
 0x352   : > { %761 = vmax.xlane.f32.xlu0 %v760_v1  ;;  %v1057_v1 = vld [vmem:[#allocation8 + $0x8] sm:$0xff] }
 0x353   : > { %843 = vmatpush.bf16.msra.mxu1 %v1057_v1 }
 0x358   : > { %v758_v4 = vpop.f32.mrf.mxu3 }
 0x35a   : > { %692 = vadd.xlane.f32.xlu0 %v691_v5 }
 0x35b   : > { %635 = vrot.lane.b32.xlu1 %v1449_v29, %s1291_s17 }
 0x3b5   : > { %v611_v6 = vpop.xlane.xlu1 %610 }
 0x3b6   : > { %v612_v7 = vsub.f32 %v605_v59, %v611_v6 }
 0x3b8   : > { %v613_v8 = vmul.f32 1.442695, %v612_v7 }
 0x3ba   : > { %1131 = vpow2.f32 %v613_v8 }
 0x3c0   : > { %v1132_v9 = vpop.eup %1131 }
 0x3c1   : > { %v615_v10 = vsel %vm519_vm1, %v1132_v9, 0.0 }
 0x3c2   : > { %616 = vadd.xlane.f32.xlu0 %v615_v10 }
 0x3c5   : > { %v762_v11 = vpop.xlane.xlu0 %761 }
 0x3c6   : > { %v763_v12 = vsub.f32 %v756_v0, %v762_v11 }
 0x3c8   : > { %v764_v13 = vmul.f32 1.442695, %v763_v12 }
 0x3ca   : > { %1133 = vpow2.f32 %v764_v13 }
 0x3cd   : > { %v636_v14 = vpop.permute.xlu1 %635  ;;  %v693_v15 = vpop.xlane.xlu0 %692 }
 0x3ce   : > { %1135 = vrcp.f32 %v693_v15  ;;  %v641_v16 = vsel %vm568_vm2, %v636_v14, 0  ;;  %v705_v22 = vand.u32 2147483648, %v693_v15  ;;  %v703_v24 = vand.u32 2147483647, %v693_v15 }
 0x3cf   : > { %650 = vmatpush.bf16.msrb.mxu0 %v641_v16  ;;  %vm699_vm8 = vweird.f32 %v693_v15 }
 0x3d0   : > { %v1134_v17 = vpop.eup %1133  ;;  %v706_v26 = vor.u32 1.1754944e-38, %v705_v22  ;;  %vm704_vm10 = vcmp.eq.f32.partialorder %v703_v24, 8.507059e+37 }
 0x3d1   : > { %v766_v18 = vsel %vm519_vm1, %v1134_v17, 0.0 }
 0x3d2   : > { %767 = vadd.xlane.f32.xlu0 %v766_v18 }
 0x3d4   : > { %v1136_v19 = vpop.eup %1135 }
 0x3d5   : > { %v695_v20 = vmul.f32 %v1136_v19, %v693_v15  ;;  %vm700_vm7 = vweird.f32 %v1136_v19 }
 0x3d6   : > { %vm701_vm9 = vmor %vm699_vm8, %vm700_vm7  ;;  %vm810_vm7 = vcmask 261312  }
 0x3d7   : > { %v696_v21 = vsub.f32 1.0, %v695_v20 }
 0x3d9   : > { %v697_v23 = vmul.f32 %v1136_v19, %v696_v21 }
 0x3db   : > { %v698_v25 = vadd.f32 %v1136_v19, %v697_v23 }
 0x3dd   : > { %v702_v27 = vsel %vm701_vm9, %v1136_v19, %v698_v25 }
 0x3de   : > { %v707_v28 = vsel %vm704_vm10, %v706_v26, %v702_v27 }
 0x3df   : > { %v708_v30 = vmul.f32 %v1130_v3, %v707_v28  ;;  %v1056_v3 = vld [vmem:[#allocation8] sm:$0xff] }
 0x3e0   : > { %844 = vmatpush.bf16.msra.mxu1 %v1056_v3 }
 0x3e1   : > { %v709_v31 = vpack.c.bf16 %v708_v30, %v708_v30 }
 0x3e3   : > { %1038 = vmatmul.msk.bf16.vlgmr.msrb.gmra.mxu2 %vm519_vm1, %v709_v31 }
 0x3e6   : > { %785 = vrot.lane.b32.xlu0 %v1449_v29, %s1296_s29  ;;  %s436_s29 = scalar_lea.vmem %s1510_s10, %s1416_s16 }
 0x435   : > { %v617_v32 = vpop.xlane.xlu0 %616 }
 0x436   : > { %1137 = vrcp.f32 %v617_v32  ;;  %v629_v37 = vand.u32 2147483648, %v617_v32  ;;  %v627_v38 = vand.u32 2147483647, %v617_v32  ;;  %vm623_vm12 = vweird.f32 %v617_v32 }
 0x438   : > { %v630_v40 = vor.u32 1.1754944e-38, %v629_v37  ;;  %vm628_vm14 = vcmp.eq.f32.partialorder %v627_v38, 8.507059e+37  ;;  %v1123_v38 = vld [vmem:[%s1508_s8] ss:$0 sm:$0xff] }
 0x43c   : > { %v1138_v33 = vpop.eup %1137 }
 0x43d   : > { %v619_v34 = vmul.f32 %v1138_v33, %v617_v32  ;;  %vm624_vm11 = vweird.f32 %v1138_v33 }
 0x43e   : > { %vm625_vm13 = vmor %vm623_vm12, %vm624_vm11 }
 0x43f   : > { %v620_v35 = vsub.f32 1.0, %v619_v34 }
 0x441   : > { %v621_v36 = vmul.f32 %v1138_v33, %v620_v35 }
 0x443   : > { %v622_v39 = vadd.f32 %v1138_v33, %v621_v36 }
 0x445   : > { %v768_v41 = vpop.xlane.xlu0 %767  ;;  %v626_v42 = vsel %vm625_vm13, %v1138_v33, %v622_v39 }
 0x446   : > { %1139 = vrcp.f32 %v768_v41  ;;  %v631_v43 = vsel %vm628_vm14, %v630_v40, %v626_v42  ;;  %v780_v48 = vand.u32 2147483648, %v768_v41  ;;  %v778_v50 = vand.u32 2147483647, %v768_v41  ;;  %v1124_v40 = vld [vmem:[%s1509_s9] ss:$0 sm:$0xff] }
 0x447   : > { %v632_v44 = vmul.f32 %v1132_v9, %v631_v43  ;;  %vm774_vm3 = vweird.f32 %v768_v41  ;;  %v1122_v9 = vld [vmem:[%s1507_s7] ss:$0 sm:$0xff] }
 0x448   : > { %v781_v52 = vor.u32 1.1754944e-38, %v780_v48  ;;  %vm779_vm5 = vcmp.eq.f32.partialorder %v778_v50, 8.507059e+37 }
 0x449   : > { %v633_v29 = vpack.c.bf16 %v632_v44, %v632_v44 }
 0x44b   : > { %1036 = vmatmul.msk.bf16.vlgmr.msrb.gmra.mxu0 %vm519_vm1, %v633_v29 }
 0x44c   : > { %v1140_v45 = vpop.eup %1139 }
 0x44d   : > { %v770_v46 = vmul.f32 %v1140_v45, %v768_v41  ;;  %vm775_vm15 = vweird.f32 %v1140_v45 }
 0x44e   : > { %vm776_vm4 = vmor %vm774_vm3, %vm775_vm15 }
 0x44f   : > { %v771_v47 = vsub.f32 1.0, %v770_v46 }
 0x451   : > { %v772_v49 = vmul.f32 %v1140_v45, %v771_v47 }
 0x453   : > { %v773_v51 = vadd.f32 %v1140_v45, %v772_v49 }
 0x455   : > { %v777_v53 = vsel %vm776_vm4, %v1140_v45, %v773_v51 }
 0x456   : > { %v782_v54 = vsel %vm779_vm5, %v781_v52, %v777_v53 }
 0x457   : > { %v783_v55 = vmul.f32 %v1134_v17, %v782_v54  ;;  %v1301_v17 = vmov 32.0  }
 0x458   : > { %v786_v56 = vpop.permute.xlu0 %785  ;;  %1141 = vrcp.f32 %v1301_v17 }
 0x459   : > { %v791_v57 = vsel %vm568_vm2, %v786_v56, 0  ;;  %v784_v58 = vpack.c.bf16 %v783_v55, %v783_v55  ;;  %vm660_vm2 = vcmask 130112  }
 0x45a   : > { %800 = vmatpush.bf16.msra.mxu0 %v791_v57 }
 0x45d   : > { %1040 = vmatmul.msk.bf16.vlgmr.msra.gmra.mxu0 %vm519_vm1, %v784_v58 }
 0x45e   : > { %v1142_v18 = vpop.eup %1141 }
 0x45f   : > { %v857_v19 = vmul.f32 32.0, %v1142_v18  ;;  %vm861_vm1 = vweird.f32 %v1142_v18 }
 0x461   : > { %v858_v20 = vsub.f32 1.0, %v857_v19 }
 0x463   : > { %v859_v21 = vmul.f32 %v1142_v18, %v858_v20 }
 0x465   : > { %v860_v22 = vadd.f32 %v1142_v18, %v859_v21 }
 0x466   : > { %v727_v59 = vpop.f32.mrf.mxu2 }
 0x467   : > { %732 = vrot.lane.b32.xlu0 %v727_v59, %s1298_s21  ;;  %v862_v23 = vsel %vm861_vm1, %v1142_v18, %v860_v22 }
 0x46e   : > { %v729_v60 = vpop.f32.mrf.mxu2 }
 0x4c8   : > { %v652_v61 = vpop.f32.mrf.mxu0 }
 0x4c9   : > { %657 = vrot.lane.b32.xlu1 %v652_v61, %s1299_s22 }
 0x4d0   : > { %v654_v62 = vpop.f32.mrf.mxu0 }
 0x4d9   : > { %v733_v5 = vpop.permute.xlu0 %732 }
 0x4da   : > { %v802_v63 = vpop.f32.mrf.mxu0 }
 0x4db   : > { %807 = vrot.lane.b32.xlu2 %v802_v63, %s1300_s25 }
 0x4e2   : > { %v804_v0 = vpop.f32.mrf.mxu0 }
 0x535   : > { %v808_v6 = vpop.permute.xlu2 %807 }
 0x53b   : > { %v658_v4 = vpop.permute.xlu1 %657 }
 0x53c   : > { %661 = vst.msk [vmem:[#allocation2] sm:$0xff] %vm660_vm2, %v658_v4 }
 0x53d   : > { %736 = vst.msk [vmem:[#allocation2] sm:$0xff] %vm735_vm6, %v733_v5 }
 0x53e   : > { %811 = vst.msk [vmem:[#allocation2] sm:$0xff] %vm810_vm7, %v808_v6 }
 0x545   : > { %v812_v7 = vld [vmem:[#allocation2] sm:$0xff] }
 0x546   : > { %v813_v8 = vpack.c.bf16 %v812_v7, %v812_v7 }
 0x548   : > { %1049 = vmatmul.msk.bf16.vlgmr.msra.gmra.mxu1 %vm460_vm0, %v813_v8 }
 0x5c5   : > { %v846_v10 = vpop.f32.mrf.mxu1 }
 0x5c6   : > { %v847_v11 = vadd.f32 %v1122_v9, %v846_v10 }
 0x5c8   : > { %v850_v12 = vadd.f32 %v847_v11, %v1422_v2 }
 0x5ca   : > { %v853_v13 = vsel %vm460_vm0, %v850_v12, 0.0  ;;  %v864_v14 = vmul.f32 %v850_v12, %v850_v12 }
 0x5cb   : > { %854 = vadd.xlane.f32.xlu1 %v853_v13 }
 0x5cc   : > { %v865_v15 = vsel %vm460_vm0, %v864_v14, 0.0 }
 0x5cd   : > { %v848_v16 = vpop.f32.mrf.mxu1  ;;  %866 = vadd.xlane.f32.xlu0 %v865_v15 }
 0x63e   : > { %v855_v24 = vpop.xlane.xlu1 %854 }
 0x63f   : > { %v863_v25 = vmul.f32 %v862_v23, %v855_v24 }
 0x640   : > { %v867_v2 = vpop.xlane.xlu0 %866 }
 0x641   : > { %v869_v26 = vmul.f32 %v863_v25, %v863_v25  ;;  %v868_v27 = vmul.f32 %v867_v2, %v862_v23  ;;  %v871_v37 = vsub.f32 %v850_v12, %v863_v25 }
 0x643   : > { %v870_v28 = vsub.f32 %v868_v27, %v869_v26 }
 0x645   : > { %v872_v30 = vadd.f32 1e-05, %v870_v28 }
 0x647   : > { %1143 = vrsqrt.f32 %v872_v30  ;;  %vm879_vm9 = vweird.f32 %v872_v30 }
 0x64d   : > { %v1144_v31 = vpop.eup %1143 }
 0x64e   : > { %v874_v32 = vmul.f32 %v1144_v31, %v872_v30  ;;  %vm880_vm8 = vweird.f32 %v1144_v31 }
 0x64f   : > { %vm881_vm10 = vmor %vm879_vm9, %vm880_vm8 }
 0x650   : > { %v875_v33 = vmul.f32 %v1144_v31, %v874_v32 }
 0x652   : > { %v876_v34 = vmul.f32 0.5, %v875_v33 }
 0x654   : > { %v877_v35 = vsub.f32 1.5, %v876_v34 }
 0x656   : > { %v878_v36 = vmul.f32 %v1144_v31, %v877_v35 }
 0x658   : > { %v882_v39 = vsel %vm881_vm10, %v1144_v31, %v878_v36 }
 0x659   : > { %v883_v41 = vmul.f32 %v882_v39, %v871_v37 }
 0x65b   : > { %v887_v42 = vmul.f32 %v1123_v38, %v883_v41 }
 0x65d   : > { %v891_v43 = vadd.f32 %v1124_v40, %v887_v42 }
 0x65f   : > { %892 = vst.msk [vmem:[%s436_s29] sm:$0xff] %vm460_vm0, %v891_v43 }
 0x660 PF: > { %s23_s13 = sadd.s32 1, %s1283_s13  }
 0x661   : > { %p20_p7 = scmp.ge.s32.totalorder %s23_s13, 4  }
 0x663   :  { %22 = sbr.rel (!%p20_p7) target bundleno = 3 (0x3), region = 110 }
 0x668   :  { %912 = vsyncpa [#allocation4], 1 }
 0x669   :  { %914 = vsyncpa [#allocation4 + $0x1], 1 }
 0x66a   :  { %915 = vsyncpa [#allocation6], 1 }
 0x66b   :  { %916 = vsyncpa [#allocation9], 1 }

</bundles_post_ra>
